<compile_context>
chip_gen: v7x
topology: tpu7x:2x2x1
jax: 0.10.0
libtpu: 0.0.40
codegen_flags: <defaults>
</compile_context>

<pallas_src>
import jax
import jax.numpy as jnp
import numpy as np
from jax import lax
from jax.experimental import pallas as pl
from jax.experimental.pallas import tpu as pltpu


# ------------------------------ Pallas kernel ------------------------------ #

def atlas_decoder_kernel(
    xg_ref,       # (T, B, 4H)  pre-projected inputs + fused layer-0 bias
    kT_ref,       # (E, B*S)    K' (Wq, scale folded in), transposed & batch-flattened
    vflat_ref,    # (B*S, 4H)   V' (out_proj and layer-0 ctx weight folded in)
    sadd_ref,     # (B, B*S)    additive score bias + block-diagonal key-padding mask
    c_init_ref,   # (B, H)      initial LSTM cell state (same for both layers)
    whh0_ref,     # (H, 4H)     layer-0 recurrent weights (gate-permuted, pre-transposed)
    wih1_ref,     # (H, 4H)     layer-1 input weights
    whh1_ref,     # (H, 4H)     layer-1 recurrent weights
    b1_ref,       # (1, 4H)     layer-1 fused bias
    out_ref,      # (T, B, H)
):
    T = xg_ref.shape[0]
    H = out_ref.shape[2]

    # Loop-invariant loads (hoisted out of the recurrence).
    kT = kT_ref[...]
    vflat = vflat_ref[...]
    sadd = sadd_ref[...]
    whh0 = whh0_ref[...]
    wih1 = wih1_ref[...]
    whh1 = whh1_ref[...]
    b1 = b1_ref[...]

    c_init = c_init_ref[...]              # (B, H)
    h_init = jnp.zeros_like(c_init)

    def cell(gates, c_prev):
        # Gate columns are pre-permuted to [i, f, o | g]: one sigmoid + one tanh per cell.
        sig = jax.nn.sigmoid(gates[:, :3 * H])
        g = jnp.tanh(gates[:, 3 * H:])
        i_g = sig[:, 0 * H:1 * H]
        f_g = sig[:, 1 * H:2 * H]
        o_g = sig[:, 2 * H:3 * H]
        c_new = f_g * c_prev + i_g * g
        h_new = o_g * jnp.tanh(c_new)
        return h_new, c_new

    def step(t, carry):
        h0, c0, h1, c1 = carry

        # ---- single-head attention, query = cell state of the top LSTM layer ----
        # Wq/bq/scale are folded into kT/sadd; off-block (cross-batch) entries of sadd are
        # -1e30 so they vanish in the softmax -> numerically equivalent to per-batch attention.
        s = jnp.dot(c1, kT, preferred_element_type=jnp.float32) + sadd        # (B, B*S)
        m = jnp.max(s, axis=-1, keepdims=True)
        p = jnp.exp(s - m)
        denom = jnp.sum(p, axis=-1, keepdims=True)
        attn = p * pl.reciprocal(denom, approx=True)                          # (B, B*S)

        # out_proj + layer-0 context input weights are folded into vflat: this single matmul
        # is the whole context contribution to the layer-0 gates.
        ctx_g = jnp.dot(attn, vflat, preferred_element_type=jnp.float32)      # (B, 4H)

        # ---- 2-layer LSTM, one time step ----
        # TODO(synk): inter-layer LSTM dropout (p=0.2) is training-only; eval semantics implemented.
        gates0 = ctx_g + xg_ref[t] + jnp.dot(h0, whh0,
                                             preferred_element_type=jnp.float32)
        h0n, c0n = cell(gates0, c0)

        gates1 = (jnp.dot(h0n, wih1, preferred_element_type=jnp.float32)
                  + jnp.dot(h1, whh1, preferred_element_type=jnp.float32)
                  + b1)
        h1n, c1n = cell(gates1, c1)

        out_ref[t] = h1n
        return (h0n, c0n, h1n, c1n)

    # T is small here; for long sequences switch to unroll=4..8 to bound code size / vregs.
    lax.fori_loop(0, T, step, (h_init, c_init, h_init, c_init), unroll=True)


# ------------------------------- JAX wrapper -------------------------------- #

def atlas_decoder_forward(params, inputs, enc_outputs, hidden_state, mask_bool):
    """inputs: (B, T, I); enc_outputs: (S, B, E); hidden_state=(h, c) with c: (2, B, E//2);
    mask_bool: (B, S) True = ignore key.  Returns (B, T, E)."""
    B, T, I = inputs.shape
    S, _, E = enc_outputs.shape
    H = E
    f32 = jnp.float32

    x_tm = jnp.transpose(inputs, (1, 0, 2)).astype(f32)           # (T, B, I)
    enc_b = jnp.transpose(enc_outputs, (1, 0, 2)).astype(f32)     # (B, S, E)
    mask_add = jnp.where(mask_bool, f32(-1e30), f32(0.0))         # (B, S)

    # Initial LSTM cell state exactly as in the PyTorch forward (h zeroed,
    # both layers start from the same concatenated c).
    c_in = hidden_state[1]                                        # (2, B, H//2)
    c_cat = jnp.concatenate([c_in[0], c_in[1]], axis=1).astype(f32)  # (B, H)

    # ---- attention params; K/V projections hoisted, Wq (scaled) folded into K ----
    wq = params["in_proj_w"][:E]
    wk = params["in_proj_w"][E:2 * E]
    wv = params["in_proj_w"][2 * E:]
    bq = params["in_proj_b"][:E]
    bk = params["in_proj_b"][E:2 * E]
    bv = params["in_proj_b"][2 * E:]
    scale = f32(1.0 / np.sqrt(E))

    K = jnp.einsum("bse,fe->bsf", enc_b, wk) + bk                 # (B, S, E)
    V = jnp.einsum("bse,fe->bsf", enc_b, wv) + bv                 # (B, S, E)

    Kq = scale * jnp.einsum("bsf,fe->bse", K, wq)                 # (B, S, E)  K' = scale * K @ Wq
    kT = Kq.reshape(B * S, E).T                                   # (E, B*S)
    s_bias = scale * jnp.einsum("bsf,f->bs", K, bq)               # (B, S)     scale * K @ bq

    # Block-diagonal additive score term for the flattened (B, B*S) score matrix:
    # on-block = key bias + own key-padding mask, off-block = -1e30 (exactly zeroed by softmax).
    eye3 = jnp.eye(B, dtype=bool)[:, :, None]                     # (B, B, 1)
    sadd = (s_bias[None, :, :]
            + jnp.where(eye3, mask_add[None, :, :], f32(-1e30))).reshape(B, B * S)

    # ---- LSTM weights: gate-column permutation [i,f,g,o] -> [i,f,o,g], pre-transposed ----
    perm = np.concatenate([np.arange(0, 2 * H), np.arange(3 * H, 4 * H),
                           np.arange(2 * H, 3 * H)])

    wih0c_t = params["w_ih_l0"][:, :E].T[:, perm]                 # (E, 4H)  context part
    wih0x_t = params["w_ih_l0"][:, E:].T[:, perm]                 # (I, 4H)  x part
    whh0_t = params["w_hh_l0"].T[:, perm]                         # (H, 4H)
    wih1_t = params["w_ih_l1"].T[:, perm]                         # (H, 4H)
    whh1_t = params["w_hh_l1"].T[:, perm]                         # (H, 4H)
    b1 = (params["b_ih_l1"] + params["b_hh_l1"])[perm][None, :]   # (1, 4H)

    wo_t = params["out_proj_w"].T                                 # (E, E)
    bo = params["out_proj_b"]                                     # (E,)

    # Fold out_proj and layer-0 context weights into V; fold bo into the layer-0 bias.
    W_cg = wo_t @ wih0c_t                                         # (E, 4H)
    vflat = (V @ W_cg).reshape(B * S, 4 * H)                      # (B*S, 4H)
    b0_full = (params["b_ih_l0"] + params["b_hh_l0"])[perm] + bo @ wih0c_t    # (4H,)

    # Hoist the x projection (+ fused layer-0 bias) out of the recurrence.
    xg = jnp.einsum("tbi,ig->tbg", x_tm, wih0x_t) + b0_full       # (T, B, 4H)

    vmem = pl.BlockSpec(memory_space=pltpu.MemorySpace.VMEM)

    # Explicit VMEM budget (everything whole-resident, f32, no tiling); tiny at these
    # shapes but re-check when S/T/H are scaled up (v7x: 64 MiB physical, v5e: 16 MiB scoped default).
    footprint = 4 * (xg.size + kT.size + vflat.size + sadd.size + c_cat.size
                     + whh0_t.size + wih1_t.size + whh1_t.size + b1.size + T * B * H)
    vmem_limit = int(min(max(4 * footprint, 16 * 1024 * 1024), 32 * 1024 * 1024))

    out_tm = pl.pallas_call(
        atlas_decoder_kernel,
        out_shape=jax.ShapeDtypeStruct((T, B, H), f32),
        in_specs=[vmem] * 9,
        out_specs=vmem,
        compiler_params=pltpu.CompilerParams(vmem_limit_bytes=vmem_limit),
    )(xg, kT, vflat, sadd, c_cat, whh0_t, wih1_t, whh1_t, b1)

    return jnp.transpose(out_tm, (1, 0, 2))                       # (B, T, H)


# ----------------------------- pure-JAX reference ---------------------------- #

def atlas_decoder_reference(params, inputs, enc_outputs, hidden_state, mask_bool):
    B, T, I = inputs.shape
    S, _, E = enc_outputs.shape
    H = E
    x_tm = jnp.transpose(inputs, (1, 0, 2)).astype(jnp.float32)
    enc = jnp.transpose(enc_outputs, (1, 0, 2)).astype(jnp.float32)

    c_in = hidden_state[1]
    c_cat = jnp.concatenate([c_in[0], c_in[1]], axis=1)
    c = jnp.stack([c_cat, c_cat], axis=0).astype(jnp.float32)
    h = jnp.zeros_like(c)

    wq, wk, wv = (params["in_proj_w"][:E], params["in_proj_w"][E:2 * E], params["in_proj_w"][2 * E:])
    bq, bk, bv = (params["in_proj_b"][:E], params["in_proj_b"][E:2 * E], params["in_proj_b"][2 * E:])
    K = jnp.einsum("bse,fe->bsf", enc, wk) + bk
    V = jnp.einsum("bse,fe->bsf", enc, wv) + bv
    neg = jnp.where(mask_bool, -1e30, 0.0)

    def cell(x_in, h_prev, c_prev, w_ih, w_hh, b_ih, b_hh):
        g = x_in @ w_ih.T + b_ih + h_prev @ w_hh.T + b_hh
        i = jax.nn.sigmoid(g[:, :H]); f = jax.nn.sigmoid(g[:, H:2 * H])
        gg = jnp.tanh(g[:, 2 * H:3 * H]); o = jax.nn.sigmoid(g[:, 3 * H:])
        c_new = f * c_prev + i * gg
        return o * jnp.tanh(c_new), c_new

    outs = []
    for t in range(T):
        q = c[1] @ wq.T + bq
        scores = jnp.einsum("be,bse->bs", q, K) / jnp.sqrt(jnp.float32(E)) + neg
        attn = jax.nn.softmax(scores, axis=-1)
        ctx = jnp.einsum("bs,bse->be", attn, V)
        ctx = ctx @ params["out_proj_w"].T + params["out_proj_b"]
        xin = jnp.concatenate([ctx, x_tm[t]], axis=-1)
        h0, c0 = cell(xin, h[0], c[0], params["w_ih_l0"], params["w_hh_l0"],
                      params["b_ih_l0"], params["b_hh_l0"])
        h1, c1 = cell(h0, h[1], c[1], params["w_ih_l1"], params["w_hh_l1"],
                      params["b_ih_l1"], params["b_hh_l1"])
        h = jnp.stack([h0, h1]); c = jnp.stack([c0, c1])
        outs.append(h1)
    return jnp.transpose(jnp.stack(outs, axis=0), (1, 0, 2))


# ---------------------------------- main ------------------------------------ #

def init_params(key, input_size, hidden_dim):
    E = hidden_dim
    H = hidden_dim
    ks = jax.random.split(key, 12)
    s_attn = 1.0 / float(np.sqrt(E))
    s_lstm = 1.0 / float(np.sqrt(H))

    def u(k, shape, s):
        return jax.random.uniform(k, shape, jnp.float32, -s, s)

    return {
        "in_proj_w": u(ks[0], (3 * E, E), s_attn),
        "in_proj_b": u(ks[1], (3 * E,), s_attn),
        "out_proj_w": u(ks[2], (E, E), s_attn),
        "out_proj_b": u(ks[3], (E,), s_attn),
        "w_ih_l0": u(ks[4], (4 * H, E + input_size), s_lstm),
        "w_hh_l0": u(ks[5], (4 * H, H), s_lstm),
        "b_ih_l0": u(ks[6], (4 * H,), s_lstm),
        "b_hh_l0": u(ks[7], (4 * H,), s_lstm),
        "w_ih_l1": u(ks[8], (4 * H, H), s_lstm),
        "w_hh_l1": u(ks[9], (4 * H, H), s_lstm),
        "b_ih_l1": u(ks[10], (4 * H,), s_lstm),
        "b_hh_l1": u(ks[11], (4 * H,), s_lstm),
    }


if __name__ == "__main__":
    B, T, S = 2, 4, 8
    INPUT_SIZE, HIDDEN = 16, 32

    key = jax.random.PRNGKey(0)
    kp, kx, ke, kh, kc = jax.random.split(key, 5)

    params = init_params(kp, INPUT_SIZE, HIDDEN)
    inputs = jax.random.normal(kx, (B, T, INPUT_SIZE), jnp.float32)
    enc_outputs = jax.random.normal(ke, (S, B, HIDDEN), jnp.float32)
    # Incoming encoder state: bidirectional-style, hidden size HIDDEN // 2 per direction.
    h_in = jax.random.normal(kh, (2, B, HIDDEN // 2), jnp.float32)
    c_in = jax.random.normal(kc, (2, B, HIDDEN // 2), jnp.float32)
    hidden_state = (h_in, c_in)
    # key_padding_mask: True = ignore key position.
    mask_bool = jnp.arange(S)[None, :] >= jnp.array([5, 7])[:, None]

    out = atlas_decoder_forward(params, inputs, enc_outputs, hidden_state, mask_bool)
    out = jax.block_until_ready(out)

    ref = atlas_decoder_reference(params, inputs, enc_outputs, hidden_state, mask_bool)
    np.testing.assert_allclose(np.asarray(out), np.asarray(ref), rtol=1e-3, atol=1e-3)

    assert out.shape == (B, T, HIDDEN)
    print("KERNEL_OK")
</pallas_src>

<mosaic_0001>
module attributes {stable_mosaic.version = 11 : i64} {
  func.func @atlas_decoder_kernel(%arg0: memref<4x2x128xf32, #tpu.memory_space<vmem>>, %arg1: memref<32x16xf32, #tpu.memory_space<vmem>>, %arg2: memref<16x128xf32, #tpu.memory_space<vmem>>, %arg3: memref<2x16xf32, #tpu.memory_space<vmem>>, %arg4: memref<2x32xf32, #tpu.memory_space<vmem>>, %arg5: memref<32x128xf32, #tpu.memory_space<vmem>>, %arg6: memref<32x128xf32, #tpu.memory_space<vmem>>, %arg7: memref<32x128xf32, #tpu.memory_space<vmem>>, %arg8: memref<1x128xf32, #tpu.memory_space<vmem>>, %arg9: memref<4x2x32xf32, #tpu.memory_space<vmem>>) attributes {dimension_semantics = [], scalar_prefetch = 0 : i64, scratch_operands = 0 : i64, tpu.core_type = #tpu.core_type<tc>} {
    %c0 = arith.constant 0 : index
    %c0_0 = arith.constant 0 : index
    %0 = vector.load %arg1[%c0, %c0_0] : memref<32x16xf32, #tpu.memory_space<vmem>>, vector<32x16xf32>
    %c0_1 = arith.constant 0 : index
    %c0_2 = arith.constant 0 : index
    %1 = vector.load %arg2[%c0_1, %c0_2] : memref<16x128xf32, #tpu.memory_space<vmem>>, vector<16x128xf32>
    %c0_3 = arith.constant 0 : index
    %c0_4 = arith.constant 0 : index
    %2 = vector.load %arg3[%c0_3, %c0_4] : memref<2x16xf32, #tpu.memory_space<vmem>>, vector<2x16xf32>
    %c0_5 = arith.constant 0 : index
    %c0_6 = arith.constant 0 : index
    %3 = vector.load %arg5[%c0_5, %c0_6] : memref<32x128xf32, #tpu.memory_space<vmem>>, vector<32x128xf32>
    %c0_7 = arith.constant 0 : index
    %c0_8 = arith.constant 0 : index
    %4 = vector.load %arg6[%c0_7, %c0_8] : memref<32x128xf32, #tpu.memory_space<vmem>>, vector<32x128xf32>
    %c0_9 = arith.constant 0 : index
    %c0_10 = arith.constant 0 : index
    %5 = vector.load %arg7[%c0_9, %c0_10] : memref<32x128xf32, #tpu.memory_space<vmem>>, vector<32x128xf32>
    %c0_11 = arith.constant 0 : index
    %c0_12 = arith.constant 0 : index
    %6 = vector.load %arg8[%c0_11, %c0_12] : memref<1x128xf32, #tpu.memory_space<vmem>>, vector<1x128xf32>
    %c0_13 = arith.constant 0 : index
    %c0_14 = arith.constant 0 : index
    %7 = vector.load %arg4[%c0_13, %c0_14] : memref<2x32xf32, #tpu.memory_space<vmem>>, vector<2x32xf32>
    %cst = arith.constant 0.000000e+00 : f32
    %8 = vector.broadcast %cst : f32 to vector<2x32xf32>
    %c0_i32 = arith.constant 0 : i32
    %cst_15 = arith.constant dense<0.000000e+00> : vector<2x16xf32>
    %9 = tpu.matmul %7, %0, %cst_15 {dimension_numbers = #tpu.dot_dimension_numbers<[1], [0], [0], [1], [0, 0, 1, 1], [], []>} : vector<2x32xf32>, vector<32x16xf32>, vector<2x16xf32> -> vector<2x16xf32>
    %10 = arith.addf %9, %2 : vector<2x16xf32>
    %cst_16 = arith.constant dense<0xFF800000> : vector<2xf32>
    %11 = vector.multi_reduction <maximumf>, %10, %cst_16 [1] : vector<2x16xf32> to vector<2xf32>
    %12 = vector.shape_cast %11 : vector<2xf32> to vector<2x1xf32>
    %13 = vector.broadcast %12 : vector<2x1xf32> to vector<2x16xf32>
    %14 = arith.subf %10, %13 : vector<2x16xf32>
    %15 = math.exp %14 : vector<2x16xf32>
    %cst_17 = arith.constant dense<0.000000e+00> : vector<2xf32>
    %16 = vector.multi_reduction <add>, %15, %cst_17 [1] : vector<2x16xf32> to vector<2xf32>
    %17 = vector.shape_cast %16 : vector<2xf32> to vector<2x1xf32>
    %18 = tpu.reciprocal %17 {approx = true} : vector<2x1xf32> -> vector<2x1xf32>
    %19 = vector.broadcast %18 : vector<2x1xf32> to vector<2x16xf32>
    %20 = arith.mulf %15, %19 : vector<2x16xf32>
    %cst_18 = arith.constant dense<0.000000e+00> : vector<2x128xf32>
    %21 = tpu.matmul %20, %1, %cst_18 {dimension_numbers = #tpu.dot_dimension_numbers<[1], [0], [0], [1], [0, 0, 1, 1], [], []>} : vector<2x16xf32>, vector<16x128xf32>, vector<2x128xf32> -> vector<2x128xf32>
    %22 = arith.index_cast %c0_i32 : i32 to index
    %c0_19 = arith.constant 0 : index
    %c0_20 = arith.constant 0 : index
    %23 = vector.load %arg0[%22, %c0_19, %c0_20] : memref<4x2x128xf32, #tpu.memory_space<vmem>>, vector<1x2x128xf32>
    %24 = vector.shape_cast %23 : vector<1x2x128xf32> to vector<2x128xf32>
    %25 = arith.addf %21, %24 : vector<2x128xf32>
    %cst_21 = arith.constant dense<0.000000e+00> : vector<2x128xf32>
    %26 = tpu.matmul %8, %3, %cst_21 {dimension_numbers = #tpu.dot_dimension_numbers<[1], [0], [0], [1], [0, 0, 1, 1], [], []>} : vector<2x32xf32>, vector<32x128xf32>, vector<2x128xf32> -> vector<2x128xf32>
    %27 = arith.addf %25, %26 : vector<2x128xf32>
    %28 = vector.extract_strided_slice %27 {offsets = [0, 0], sizes = [2, 96], strides = [1, 1]} : vector<2x128xf32> to vector<2x96xf32>
    %29 = arith.negf %28 : vector<2x96xf32>
    %30 = math.exp %29 : vector<2x96xf32>
    %cst_22 = arith.constant 1.000000e+00 : f32
    %31 = vector.broadcast %cst_22 : f32 to vector<2x96xf32>
    %32 = arith.addf %31, %30 : vector<2x96xf32>
    %33 = arith.divf %31, %32 : vector<2x96xf32>
    %34 = vector.extract_strided_slice %27 {offsets = [0, 96], sizes = [2, 32], strides = [1, 1]} : vector<2x128xf32> to vector<2x32xf32>
    %35 = math.tanh %34 : vector<2x32xf32>
    %36 = vector.extract_strided_slice %33 {offsets = [0, 0], sizes = [2, 32], strides = [1, 1]} : vector<2x96xf32> to vector<2x32xf32>
    %37 = vector.extract_strided_slice %33 {offsets = [0, 32], sizes = [2, 32], strides = [1, 1]} : vector<2x96xf32> to vector<2x32xf32>
    %38 = vector.extract_strided_slice %33 {offsets = [0, 64], sizes = [2, 32], strides = [1, 1]} : vector<2x96xf32> to vector<2x32xf32>
    %39 = arith.mulf %37, %7 : vector<2x32xf32>
    %40 = arith.mulf %36, %35 : vector<2x32xf32>
    %41 = arith.addf %39, %40 : vector<2x32xf32>
    %42 = math.tanh %41 : vector<2x32xf32>
    %43 = arith.mulf %38, %42 : vector<2x32xf32>
    %cst_23 = arith.constant dense<0.000000e+00> : vector<2x128xf32>
    %44 = tpu.matmul %43, %4, %cst_23 {dimension_numbers = #tpu.dot_dimension_numbers<[1], [0], [0], [1], [0, 0, 1, 1], [], []>} : vector<2x32xf32>, vector<32x128xf32>, vector<2x128xf32> -> vector<2x128xf32>
    %cst_24 = arith.constant dense<0.000000e+00> : vector<2x128xf32>
    %45 = tpu.matmul %8, %5, %cst_24 {dimension_numbers = #tpu.dot_dimension_numbers<[1], [0], [0], [1], [0, 0, 1, 1], [], []>} : vector<2x32xf32>, vector<32x128xf32>, vector<2x128xf32> -> vector<2x128xf32>
    %46 = arith.addf %44, %45 : vector<2x128xf32>
    %47 = vector.broadcast %6 : vector<1x128xf32> to vector<2x128xf32>
    %48 = arith.addf %46, %47 : vector<2x128xf32>
    %49 = vector.extract_strided_slice %48 {offsets = [0, 0], sizes = [2, 96], strides = [1, 1]} : vector<2x128xf32> to vector<2x96xf32>
    %50 = arith.negf %49 : vector<2x96xf32>
    %51 = math.exp %50 : vector<2x96xf32>
    %cst_25 = arith.constant 1.000000e+00 : f32
    %52 = vector.broadcast %cst_25 : f32 to vector<2x96xf32>
    %53 = arith.addf %52, %51 : vector<2x96xf32>
    %54 = arith.divf %52, %53 : vector<2x96xf32>
    %55 = vector.extract_strided_slice %48 {offsets = [0, 96], sizes = [2, 32], strides = [1, 1]} : vector<2x128xf32> to vector<2x32xf32>
    %56 = math.tanh %55 : vector<2x32xf32>
    %57 = vector.extract_strided_slice %54 {offsets = [0, 0], sizes = [2, 32], strides = [1, 1]} : vector<2x96xf32> to vector<2x32xf32>
    %58 = vector.extract_strided_slice %54 {offsets = [0, 32], sizes = [2, 32], strides = [1, 1]} : vector<2x96xf32> to vector<2x32xf32>
    %59 = vector.extract_strided_slice %54 {offsets = [0, 64], sizes = [2, 32], strides = [1, 1]} : vector<2x96xf32> to vector<2x32xf32>
    %60 = arith.mulf %58, %7 : vector<2x32xf32>
    %61 = arith.mulf %57, %56 : vector<2x32xf32>
    %62 = arith.addf %60, %61 : vector<2x32xf32>
    %63 = math.tanh %62 : vector<2x32xf32>
    %64 = arith.mulf %59, %63 : vector<2x32xf32>
    %65 = arith.index_cast %c0_i32 : i32 to index
    %c0_26 = arith.constant 0 : index
    %c0_27 = arith.constant 0 : index
    %66 = vector.load %arg9[%65, %c0_26, %c0_27] : memref<4x2x32xf32, #tpu.memory_space<vmem>>, vector<1x2x32xf32>
    %67 = vector.shape_cast %66 : vector<1x2x32xf32> to vector<2x32xf32>
    %68 = vector.shape_cast %64 : vector<2x32xf32> to vector<1x2x32xf32>
    tpu.vector_store %arg9[%65, %c0_26, %c0_27], %68 {strides = array<i32>} : memref<4x2x32xf32, #tpu.memory_space<vmem>>, vector<1x2x32xf32>,
    %c1_i32 = arith.constant 1 : i32
    %cst_28 = arith.constant dense<0.000000e+00> : vector<2x16xf32>
    %69 = tpu.matmul %62, %0, %cst_28 {dimension_numbers = #tpu.dot_dimension_numbers<[1], [0], [0], [1], [0, 0, 1, 1], [], []>} : vector<2x32xf32>, vector<32x16xf32>, vector<2x16xf32> -> vector<2x16xf32>
    %70 = arith.addf %69, %2 : vector<2x16xf32>
    %cst_29 = arith.constant dense<0xFF800000> : vector<2xf32>
    %71 = vector.multi_reduction <maximumf>, %70, %cst_29 [1] : vector<2x16xf32> to vector<2xf32>
    %72 = vector.shape_cast %71 : vector<2xf32> to vector<2x1xf32>
    %73 = vector.broadcast %72 : vector<2x1xf32> to vector<2x16xf32>
    %74 = arith.subf %70, %73 : vector<2x16xf32>
    %75 = math.exp %74 : vector<2x16xf32>
    %cst_30 = arith.constant dense<0.000000e+00> : vector<2xf32>
    %76 = vector.multi_reduction <add>, %75, %cst_30 [1] : vector<2x16xf32> to vector<2xf32>
    %77 = vector.shape_cast %76 : vector<2xf32> to vector<2x1xf32>
    %78 = tpu.reciprocal %77 {approx = true} : vector<2x1xf32> -> vector<2x1xf32>
    %79 = vector.broadcast %78 : vector<2x1xf32> to vector<2x16xf32>
    %80 = arith.mulf %75, %79 : vector<2x16xf32>
    %cst_31 = arith.constant dense<0.000000e+00> : vector<2x128xf32>
    %81 = tpu.matmul %80, %1, %cst_31 {dimension_numbers = #tpu.dot_dimension_numbers<[1], [0], [0], [1], [0, 0, 1, 1], [], []>} : vector<2x16xf32>, vector<16x128xf32>, vector<2x128xf32> -> vector<2x128xf32>
    %82 = arith.index_cast %c1_i32 : i32 to index
    %c0_32 = arith.constant 0 : index
    %c0_33 = arith.constant 0 : index
    %83 = vector.load %arg0[%82, %c0_32, %c0_33] : memref<4x2x128xf32, #tpu.memory_space<vmem>>, vector<1x2x128xf32>
    %84 = vector.shape_cast %83 : vector<1x2x128xf32> to vector<2x128xf32>
    %85 = arith.addf %81, %84 : vector<2x128xf32>
    %cst_34 = arith.constant dense<0.000000e+00> : vector<2x128xf32>
    %86 = tpu.matmul %43, %3, %cst_34 {dimension_numbers = #tpu.dot_dimension_numbers<[1], [0], [0], [1], [0, 0, 1, 1], [], []>} : vector<2x32xf32>, vector<32x128xf32>, vector<2x128xf32> -> vector<2x128xf32>
    %87 = arith.addf %85, %86 : vector<2x128xf32>
    %88 = vector.extract_strided_slice %87 {offsets = [0, 0], sizes = [2, 96], strides = [1, 1]} : vector<2x128xf32> to vector<2x96xf32>
    %89 = arith.negf %88 : vector<2x96xf32>
    %90 = math.exp %89 : vector<2x96xf32>
    %cst_35 = arith.constant 1.000000e+00 : f32
    %91 = vector.broadcast %cst_35 : f32 to vector<2x96xf32>
    %92 = arith.addf %91, %90 : vector<2x96xf32>
    %93 = arith.divf %91, %92 : vector<2x96xf32>
    %94 = vector.extract_strided_slice %87 {offsets = [0, 96], sizes = [2, 32], strides = [1, 1]} : vector<2x128xf32> to vector<2x32xf32>
    %95 = math.tanh %94 : vector<2x32xf32>
    %96 = vector.extract_strided_slice %93 {offsets = [0, 0], sizes = [2, 32], strides = [1, 1]} : vector<2x96xf32> to vector<2x32xf32>
    %97 = vector.extract_strided_slice %93 {offsets = [0, 32], sizes = [2, 32], strides = [1, 1]} : vector<2x96xf32> to vector<2x32xf32>
    %98 = vector.extract_strided_slice %93 {offsets = [0, 64], sizes = [2, 32], strides = [1, 1]} : vector<2x96xf32> to vector<2x32xf32>
    %99 = arith.mulf %97, %41 : vector<2x32xf32>
    %100 = arith.mulf %96, %95 : vector<2x32xf32>
    %101 = arith.addf %99, %100 : vector<2x32xf32>
    %102 = math.tanh %101 : vector<2x32xf32>
    %103 = arith.mulf %98, %102 : vector<2x32xf32>
    %cst_36 = arith.constant dense<0.000000e+00> : vector<2x128xf32>
    %104 = tpu.matmul %103, %4, %cst_36 {dimension_numbers = #tpu.dot_dimension_numbers<[1], [0], [0], [1], [0, 0, 1, 1], [], []>} : vector<2x32xf32>, vector<32x128xf32>, vector<2x128xf32> -> vector<2x128xf32>
    %cst_37 = arith.constant dense<0.000000e+00> : vector<2x128xf32>
    %105 = tpu.matmul %64, %5, %cst_37 {dimension_numbers = #tpu.dot_dimension_numbers<[1], [0], [0], [1], [0, 0, 1, 1], [], []>} : vector<2x32xf32>, vector<32x128xf32>, vector<2x128xf32> -> vector<2x128xf32>
    %106 = arith.addf %104, %105 : vector<2x128xf32>
    %107 = vector.broadcast %6 : vector<1x128xf32> to vector<2x128xf32>
    %108 = arith.addf %106, %107 : vector<2x128xf32>
    %109 = vector.extract_strided_slice %108 {offsets = [0, 0], sizes = [2, 96], strides = [1, 1]} : vector<2x128xf32> to vector<2x96xf32>
    %110 = arith.negf %109 : vector<2x96xf32>
    %111 = math.exp %110 : vector<2x96xf32>
    %cst_38 = arith.constant 1.000000e+00 : f32
    %112 = vector.broadcast %cst_38 : f32 to vector<2x96xf32>
    %113 = arith.addf %112, %111 : vector<2x96xf32>
    %114 = arith.divf %112, %113 : vector<2x96xf32>
    %115 = vector.extract_strided_slice %108 {offsets = [0, 96], sizes = [2, 32], strides = [1, 1]} : vector<2x128xf32> to vector<2x32xf32>
    %116 = math.tanh %115 : vector<2x32xf32>
    %117 = vector.extract_strided_slice %114 {offsets = [0, 0], sizes = [2, 32], strides = [1, 1]} : vector<2x96xf32> to vector<2x32xf32>
    %118 = vector.extract_strided_slice %114 {offsets = [0, 32], sizes = [2, 32], strides = [1, 1]} : vector<2x96xf32> to vector<2x32xf32>
    %119 = vector.extract_strided_slice %114 {offsets = [0, 64], sizes = [2, 32], strides = [1, 1]} : vector<2x96xf32> to vector<2x32xf32>
    %120 = arith.mulf %118, %62 : vector<2x32xf32>
    %121 = arith.mulf %117, %116 : vector<2x32xf32>
    %122 = arith.addf %120, %121 : vector<2x32xf32>
    %123 = math.tanh %122 : vector<2x32xf32>
    %124 = arith.mulf %119, %123 : vector<2x32xf32>
    %125 = arith.index_cast %c1_i32 : i32 to index
    %c0_39 = arith.constant 0 : index
    %c0_40 = arith.constant 0 : index
    %126 = vector.load %arg9[%125, %c0_39, %c0_40] : memref<4x2x32xf32, #tpu.memory_space<vmem>>, vector<1x2x32xf32>
    %127 = vector.shape_cast %126 : vector<1x2x32xf32> to vector<2x32xf32>
    %128 = vector.shape_cast %124 : vector<2x32xf32> to vector<1x2x32xf32>
    tpu.vector_store %arg9[%125, %c0_39, %c0_40], %128 {strides = array<i32>} : memref<4x2x32xf32, #tpu.memory_space<vmem>>, vector<1x2x32xf32>,
    %c2_i32 = arith.constant 2 : i32
    %cst_41 = arith.constant dense<0.000000e+00> : vector<2x16xf32>
    %129 = tpu.matmul %122, %0, %cst_41 {dimension_numbers = #tpu.dot_dimension_numbers<[1], [0], [0], [1], [0, 0, 1, 1], [], []>} : vector<2x32xf32>, vector<32x16xf32>, vector<2x16xf32> -> vector<2x16xf32>
    %130 = arith.addf %129, %2 : vector<2x16xf32>
    %cst_42 = arith.constant dense<0xFF800000> : vector<2xf32>
    %131 = vector.multi_reduction <maximumf>, %130, %cst_42 [1] : vector<2x16xf32> to vector<2xf32>
    %132 = vector.shape_cast %131 : vector<2xf32> to vector<2x1xf32>
    %133 = vector.broadcast %132 : vector<2x1xf32> to vector<2x16xf32>
    %134 = arith.subf %130, %133 : vector<2x16xf32>
    %135 = math.exp %134 : vector<2x16xf32>
    %cst_43 = arith.constant dense<0.000000e+00> : vector<2xf32>
    %136 = vector.multi_reduction <add>, %135, %cst_43 [1] : vector<2x16xf32> to vector<2xf32>
    %137 = vector.shape_cast %136 : vector<2xf32> to vector<2x1xf32>
    %138 = tpu.reciprocal %137 {approx = true} : vector<2x1xf32> -> vector<2x1xf32>
    %139 = vector.broadcast %138 : vector<2x1xf32> to vector<2x16xf32>
    %140 = arith.mulf %135, %139 : vector<2x16xf32>
    %cst_44 = arith.constant dense<0.000000e+00> : vector<2x128xf32>
    %141 = tpu.matmul %140, %1, %cst_44 {dimension_numbers = #tpu.dot_dimension_numbers<[1], [0], [0], [1], [0, 0, 1, 1], [], []>} : vector<2x16xf32>, vector<16x128xf32>, vector<2x128xf32> -> vector<2x128xf32>
    %142 = arith.index_cast %c2_i32 : i32 to index
    %c0_45 = arith.constant 0 : index
    %c0_46 = arith.constant 0 : index
    %143 = vector.load %arg0[%142, %c0_45, %c0_46] : memref<4x2x128xf32, #tpu.memory_space<vmem>>, vector<1x2x128xf32>
    %144 = vector.shape_cast %143 : vector<1x2x128xf32> to vector<2x128xf32>
    %145 = arith.addf %141, %144 : vector<2x128xf32>
    %cst_47 = arith.constant dense<0.000000e+00> : vector<2x128xf32>
    %146 = tpu.matmul %103, %3, %cst_47 {dimension_numbers = #tpu.dot_dimension_numbers<[1], [0], [0], [1], [0, 0, 1, 1], [], []>} : vector<2x32xf32>, vector<32x128xf32>, vector<2x128xf32> -> vector<2x128xf32>
    %147 = arith.addf %145, %146 : vector<2x128xf32>
    %148 = vector.extract_strided_slice %147 {offsets = [0, 0], sizes = [2, 96], strides = [1, 1]} : vector<2x128xf32> to vector<2x96xf32>
    %149 = arith.negf %148 : vector<2x96xf32>
    %150 = math.exp %149 : vector<2x96xf32>
    %cst_48 = arith.constant 1.000000e+00 : f32
    %151 = vector.broadcast %cst_48 : f32 to vector<2x96xf32>
    %152 = arith.addf %151, %150 : vector<2x96xf32>
    %153 = arith.divf %151, %152 : vector<2x96xf32>
    %154 = vector.extract_strided_slice %147 {offsets = [0, 96], sizes = [2, 32], strides = [1, 1]} : vector<2x128xf32> to vector<2x32xf32>
    %155 = math.tanh %154 : vector<2x32xf32>
    %156 = vector.extract_strided_slice %153 {offsets = [0, 0], sizes = [2, 32], strides = [1, 1]} : vector<2x96xf32> to vector<2x32xf32>
    %157 = vector.extract_strided_slice %153 {offsets = [0, 32], sizes = [2, 32], strides = [1, 1]} : vector<2x96xf32> to vector<2x32xf32>
    %158 = vector.extract_strided_slice %153 {offsets = [0, 64], sizes = [2, 32], strides = [1, 1]} : vector<2x96xf32> to vector<2x32xf32>
    %159 = arith.mulf %157, %101 : vector<2x32xf32>
    %160 = arith.mulf %156, %155 : vector<2x32xf32>
    %161 = arith.addf %159, %160 : vector<2x32xf32>
    %162 = math.tanh %161 : vector<2x32xf32>
    %163 = arith.mulf %158, %162 : vector<2x32xf32>
    %cst_49 = arith.constant dense<0.000000e+00> : vector<2x128xf32>
    %164 = tpu.matmul %163, %4, %cst_49 {dimension_numbers = #tpu.dot_dimension_numbers<[1], [0], [0], [1], [0, 0, 1, 1], [], []>} : vector<2x32xf32>, vector<32x128xf32>, vector<2x128xf32> -> vector<2x128xf32>
    %cst_50 = arith.constant dense<0.000000e+00> : vector<2x128xf32>
    %165 = tpu.matmul %124, %5, %cst_50 {dimension_numbers = #tpu.dot_dimension_numbers<[1], [0], [0], [1], [0, 0, 1, 1], [], []>} : vector<2x32xf32>, vector<32x128xf32>, vector<2x128xf32> -> vector<2x128xf32>
    %166 = arith.addf %164, %165 : vector<2x128xf32>
    %167 = vector.broadcast %6 : vector<1x128xf32> to vector<2x128xf32>
    %168 = arith.addf %166, %167 : vector<2x128xf32>
    %169 = vector.extract_strided_slice %168 {offsets = [0, 0], sizes = [2, 96], strides = [1, 1]} : vector<2x128xf32> to vector<2x96xf32>
    %170 = arith.negf %169 : vector<2x96xf32>
    %171 = math.exp %170 : vector<2x96xf32>
    %cst_51 = arith.constant 1.000000e+00 : f32
    %172 = vector.broadcast %cst_51 : f32 to vector<2x96xf32>
    %173 = arith.addf %172, %171 : vector<2x96xf32>
    %174 = arith.divf %172, %173 : vector<2x96xf32>
    %175 = vector.extract_strided_slice %168 {offsets = [0, 96], sizes = [2, 32], strides = [1, 1]} : vector<2x128xf32> to vector<2x32xf32>
    %176 = math.tanh %175 : vector<2x32xf32>
    %177 = vector.extract_strided_slice %174 {offsets = [0, 0], sizes = [2, 32], strides = [1, 1]} : vector<2x96xf32> to vector<2x32xf32>
    %178 = vector.extract_strided_slice %174 {offsets = [0, 32], sizes = [2, 32], strides = [1, 1]} : vector<2x96xf32> to vector<2x32xf32>
    %179 = vector.extract_strided_slice %174 {offsets = [0, 64], sizes = [2, 32], strides = [1, 1]} : vector<2x96xf32> to vector<2x32xf32>
    %180 = arith.mulf %178, %122 : vector<2x32xf32>
    %181 = arith.mulf %177, %176 : vector<2x32xf32>
    %182 = arith.addf %180, %181 : vector<2x32xf32>
    %183 = math.tanh %182 : vector<2x32xf32>
    %184 = arith.mulf %179, %183 : vector<2x32xf32>
    %185 = arith.index_cast %c2_i32 : i32 to index
    %c0_52 = arith.constant 0 : index
    %c0_53 = arith.constant 0 : index
    %186 = vector.load %arg9[%185, %c0_52, %c0_53] : memref<4x2x32xf32, #tpu.memory_space<vmem>>, vector<1x2x32xf32>
    %187 = vector.shape_cast %186 : vector<1x2x32xf32> to vector<2x32xf32>
    %188 = vector.shape_cast %184 : vector<2x32xf32> to vector<1x2x32xf32>
    tpu.vector_store %arg9[%185, %c0_52, %c0_53], %188 {strides = array<i32>} : memref<4x2x32xf32, #tpu.memory_space<vmem>>, vector<1x2x32xf32>,
    %c3_i32 = arith.constant 3 : i32
    %cst_54 = arith.constant dense<0.000000e+00> : vector<2x16xf32>
    %189 = tpu.matmul %182, %0, %cst_54 {dimension_numbers = #tpu.dot_dimension_numbers<[1], [0], [0], [1], [0, 0, 1, 1], [], []>} : vector<2x32xf32>, vector<32x16xf32>, vector<2x16xf32> -> vector<2x16xf32>
    %190 = arith.addf %189, %2 : vector<2x16xf32>
    %cst_55 = arith.constant dense<0xFF800000> : vector<2xf32>
    %191 = vector.multi_reduction <maximumf>, %190, %cst_55 [1] : vector<2x16xf32> to vector<2xf32>
    %192 = vector.shape_cast %191 : vector<2xf32> to vector<2x1xf32>
    %193 = vector.broadcast %192 : vector<2x1xf32> to vector<2x16xf32>
    %194 = arith.subf %190, %193 : vector<2x16xf32>
    %195 = math.exp %194 : vector<2x16xf32>
    %cst_56 = arith.constant dense<0.000000e+00> : vector<2xf32>
    %196 = vector.multi_reduction <add>, %195, %cst_56 [1] : vector<2x16xf32> to vector<2xf32>
    %197 = vector.shape_cast %196 : vector<2xf32> to vector<2x1xf32>
    %198 = tpu.reciprocal %197 {approx = true} : vector<2x1xf32> -> vector<2x1xf32>
    %199 = vector.broadcast %198 : vector<2x1xf32> to vector<2x16xf32>
    %200 = arith.mulf %195, %199 : vector<2x16xf32>
    %cst_57 = arith.constant dense<0.000000e+00> : vector<2x128xf32>
    %201 = tpu.matmul %200, %1, %cst_57 {dimension_numbers = #tpu.dot_dimension_numbers<[1], [0], [0], [1], [0, 0, 1, 1], [], []>} : vector<2x16xf32>, vector<16x128xf32>, vector<2x128xf32> -> vector<2x128xf32>
    %202 = arith.index_cast %c3_i32 : i32 to index
    %c0_58 = arith.constant 0 : index
    %c0_59 = arith.constant 0 : index
    %203 = vector.load %arg0[%202, %c0_58, %c0_59] : memref<4x2x128xf32, #tpu.memory_space<vmem>>, vector<1x2x128xf32>
    %204 = vector.shape_cast %203 : vector<1x2x128xf32> to vector<2x128xf32>
    %205 = arith.addf %201, %204 : vector<2x128xf32>
    %cst_60 = arith.constant dense<0.000000e+00> : vector<2x128xf32>
    %206 = tpu.matmul %163, %3, %cst_60 {dimension_numbers = #tpu.dot_dimension_numbers<[1], [0], [0], [1], [0, 0, 1, 1], [], []>} : vector<2x32xf32>, vector<32x128xf32>, vector<2x128xf32> -> vector<2x128xf32>
    %207 = arith.addf %205, %206 : vector<2x128xf32>
    %208 = vector.extract_strided_slice %207 {offsets = [0, 0], sizes = [2, 96], strides = [1, 1]} : vector<2x128xf32> to vector<2x96xf32>
    %209 = arith.negf %208 : vector<2x96xf32>
    %210 = math.exp %209 : vector<2x96xf32>
    %cst_61 = arith.constant 1.000000e+00 : f32
    %211 = vector.broadcast %cst_61 : f32 to vector<2x96xf32>
    %212 = arith.addf %211, %210 : vector<2x96xf32>
    %213 = arith.divf %211, %212 : vector<2x96xf32>
    %214 = vector.extract_strided_slice %207 {offsets = [0, 96], sizes = [2, 32], strides = [1, 1]} : vector<2x128xf32> to vector<2x32xf32>
    %215 = math.tanh %214 : vector<2x32xf32>
    %216 = vector.extract_strided_slice %213 {offsets = [0, 0], sizes = [2, 32], strides = [1, 1]} : vector<2x96xf32> to vector<2x32xf32>
    %217 = vector.extract_strided_slice %213 {offsets = [0, 32], sizes = [2, 32], strides = [1, 1]} : vector<2x96xf32> to vector<2x32xf32>
    %218 = vector.extract_strided_slice %213 {offsets = [0, 64], sizes = [2, 32], strides = [1, 1]} : vector<2x96xf32> to vector<2x32xf32>
    %219 = arith.mulf %217, %161 : vector<2x32xf32>
    %220 = arith.mulf %216, %215 : vector<2x32xf32>
    %221 = arith.addf %219, %220 : vector<2x32xf32>
    %222 = math.tanh %221 : vector<2x32xf32>
    %223 = arith.mulf %218, %222 : vector<2x32xf32>
    %cst_62 = arith.constant dense<0.000000e+00> : vector<2x128xf32>
    %224 = tpu.matmul %223, %4, %cst_62 {dimension_numbers = #tpu.dot_dimension_numbers<[1], [0], [0], [1], [0, 0, 1, 1], [], []>} : vector<2x32xf32>, vector<32x128xf32>, vector<2x128xf32> -> vector<2x128xf32>
    %cst_63 = arith.constant dense<0.000000e+00> : vector<2x128xf32>
    %225 = tpu.matmul %184, %5, %cst_63 {dimension_numbers = #tpu.dot_dimension_numbers<[1], [0], [0], [1], [0, 0, 1, 1], [], []>} : vector<2x32xf32>, vector<32x128xf32>, vector<2x128xf32> -> vector<2x128xf32>
    %226 = arith.addf %224, %225 : vector<2x128xf32>
    %227 = vector.broadcast %6 : vector<1x128xf32> to vector<2x128xf32>
    %228 = arith.addf %226, %227 : vector<2x128xf32>
    %229 = vector.extract_strided_slice %228 {offsets = [0, 0], sizes = [2, 96], strides = [1, 1]} : vector<2x128xf32> to vector<2x96xf32>
    %230 = arith.negf %229 : vector<2x96xf32>
    %231 = math.exp %230 : vector<2x96xf32>
    %cst_64 = arith.constant 1.000000e+00 : f32
    %232 = vector.broadcast %cst_64 : f32 to vector<2x96xf32>
    %233 = arith.addf %232, %231 : vector<2x96xf32>
    %234 = arith.divf %232, %233 : vector<2x96xf32>
    %235 = vector.extract_strided_slice %228 {offsets = [0, 96], sizes = [2, 32], strides = [1, 1]} : vector<2x128xf32> to vector<2x32xf32>
    %236 = math.tanh %235 : vector<2x32xf32>
    %237 = vector.extract_strided_slice %234 {offsets = [0, 0], sizes = [2, 32], strides = [1, 1]} : vector<2x96xf32> to vector<2x32xf32>
    %238 = vector.extract_strided_slice %234 {offsets = [0, 32], sizes = [2, 32], strides = [1, 1]} : vector<2x96xf32> to vector<2x32xf32>
    %239 = vector.extract_strided_slice %234 {offsets = [0, 64], sizes = [2, 32], strides = [1, 1]} : vector<2x96xf32> to vector<2x32xf32>
    %240 = arith.mulf %238, %182 : vector<2x32xf32>
    %241 = arith.mulf %237, %236 : vector<2x32xf32>
    %242 = arith.addf %240, %241 : vector<2x32xf32>
    %243 = math.tanh %242 : vector<2x32xf32>
    %244 = arith.mulf %239, %243 : vector<2x32xf32>
    %245 = arith.index_cast %c3_i32 : i32 to index
    %c0_65 = arith.constant 0 : index
    %c0_66 = arith.constant 0 : index
    %246 = vector.load %arg9[%245, %c0_65, %c0_66] : memref<4x2x32xf32, #tpu.memory_space<vmem>>, vector<1x2x32xf32>
    %247 = vector.shape_cast %246 : vector<1x2x32xf32> to vector<2x32xf32>
    %248 = vector.shape_cast %244 : vector<2x32xf32> to vector<1x2x32xf32>
    tpu.vector_store %arg9[%245, %c0_65, %c0_66], %248 {strides = array<i32>} : memref<4x2x32xf32, #tpu.memory_space<vmem>>, vector<1x2x32xf32>,
    %c4_i32 = arith.constant 4 : i32
    return
  }
}

</mosaic_0001>

<bundles_post_ra>
// kernel: tpu_custom_call.1
= control target key start
LH: loop header
LB: loop body
LE: loop exit
PB: predicated region body
PF: predicated region fallthrough
CT: control target
= control target key end

     0   :  { %14 = vsyncpa [#allocation3], 0  ;;  %s2953_s0 = inlined_call_operand.hbm [shape: f32[4,2,128], index: 0, kind: input, shape index: {}]   ;;  %s2954_s1 = inlined_call_operand.vmem [shape: f32[32,16], index: 1, kind: input, shape index: {}]   ;;  %s2955_s2 = inlined_call_operand.hbm [shape: f32[16,128], index: 2, kind: input, shape index: {}]   ;;  %s2956_s3 = inlined_call_operand.vmem [shape: f32[2,16], index: 3, kind: input, shape index: {}]   ;;  %s2957_s4 = inlined_call_operand.hbm [shape: f32[2,32], index: 4, kind: input, shape index: {}]   ;;  %s2958_s5 = inlined_call_operand.vmem [shape: f32[32,128], index: 5, kind: input, shape index: {}]   ;;  %s2959_s6 = inlined_call_operand.vmem [shape: f32[32,128], index: 6, kind: input, shape index: {}]   ;;  %s2960_s7 = inlined_call_operand.hbm [shape: f32[32,128], index: 7, kind: input, shape index: {}]   ;;  %s2961_s8 = inlined_call_operand.vmem [shape: f32[1,128], index: 8, kind: input, shape index: {}]   ;;  %s2962_s9 = inlined_call_operand.hbm [shape: f32[4,2,32], index: 9, kind: output, shape index: {}]  }
   0x1   :  { %15 = vsyncpa [#allocation6], 0 }
   0x2   :  { %16 = vsyncpa [#allocation9], 0 }
   0x3   :  { %17 = vsyncpa [#allocation4], 0  ;;  %s2526_s30 = smov [#allocation5]   ;;  %s2408_s13 = scalar_lea.hbm %s2955_s2, 256 }
   0x4   :  { %s37_s10 = sshll.u32 %s2526_s30, 4  ;;  %p2409_p0 = scmp.ne.s32.totalorder %s2955_s2, %s2408_s13  ;;  %s38_s10 = int_to_ptr.vmem [resolvable:$true] %s37_s10 }
   0x5   :  { %p2412_p1 = scmp.lt.u32.totalorder %s2408_s13, %s2955_s2 }
   0x7   :  { %p2414_p2 = pnand %p2412_p1, %p2409_p0 }
   0x9   :  { %2417 = shalt.err (!%p2414_p2)
}
   0xa   :  { %s2418_s18 = scalar_lea.vmem %s38_s10, 256  ;;  %p2423_p4 = scmp.lt.s32.totalorder %s38_s10, %s38_s10 }
   0xb   :  { %p2419_p3 = scmp.ne.s32.totalorder %s38_s10, %s2418_s18  ;;  %p2424_p5 = scmp.lt.s32.totalorder %s2418_s18, %s2418_s18 }
   0xd   :  { %p2425_p6 = por %p2424_p5, %p2423_p4 }
   0xf   :  { %p2426_p7 = pnand %p2425_p6, %p2419_p3 }
  0x11   :  { %2429 = shalt.err (!%p2426_p7)
}
  0x12   :  { %s2527_s19 = smov 128   ;;  %s2528_s20 = smov 8  }
  0x13   :  { %43 = dma.hbm_to_vmem [thread:$0]  %s2955_s2, 256, %s38_s10, [#allocation6], %s2527_s19, %s2527_s19, %s2528_s20  }
  0x14   :  { %s2529_s23 = smov [#allocation2]   ;;  %s2430_s27 = scalar_lea.hbm %s2953_s0, 128 }
  0x15   :  { %s23_s24 = sshll.u32 %s2529_s23, 4  ;;  %p2431_p8 = scmp.ne.s32.totalorder %s2953_s0, %s2430_s27  ;;  %s24_s24 = int_to_ptr.vmem [resolvable:$true] %s23_s24 }
  0x16   :  { %p2434_p9 = scmp.lt.u32.totalorder %s2430_s27, %s2953_s0 }
  0x18   :  { %p2436_p10 = pnand %p2434_p9, %p2431_p8 }
  0x1a   :  { %2439 = shalt.err (!%p2436_p10)
}
  0x1b   :  { %s2440_s12 = scalar_lea.vmem %s24_s24, 128  ;;  %p2445_p12 = scmp.lt.s32.totalorder %s24_s24, %s24_s24 }
  0x1c   :  { %p2441_p11 = scmp.ne.s32.totalorder %s24_s24, %s2440_s12  ;;  %p2446_p13 = scmp.lt.s32.totalorder %s2440_s12, %s2440_s12 }
  0x1e   :  { %p2447_p0 = por %p2446_p13, %p2445_p12 }
  0x20   :  { %p2448_p1 = pnand %p2447_p0, %p2441_p11 }
  0x22   :  { %2451 = shalt.err (!%p2448_p1)
}
  0x23   :  { %s2530_s2 = smov 32   ;;  %s2531_s10 = smov 2  }
  0x24   :  { %29 = dma.hbm_to_vmem [thread:$0]  %s2953_s0, 128, %s24_s24, [#allocation3], %s2530_s2, %s2530_s2, %s2531_s10  }
  0x25   :  { %s2532_s15 = smov [#allocation7]   ;;  %s2533_s17 = smov [#allocation8]  }
  0x26   :  { %s52_s16 = sshll.u32 %s2532_s15, 4  ;;  %s65_s18 = sshll.u32 %s2533_s17, 4  ;;  %s53_s16 = int_to_ptr.vmem [resolvable:$true] %s52_s16  ;;  %s2620_s18 = int_to_ptr.vmem [resolvable:$true] %s65_s18 }
  0x27   :  { %s2452_s23 = scalar_lea.hbm %s2957_s4, 32 }
  0x28   :  { %p2453_p2 = scmp.ne.s32.totalorder %s2957_s4, %s2452_s23  ;;  %p2456_p3 = scmp.lt.u32.totalorder %s2452_s23, %s2957_s4 }
  0x2a   :  { %p2458_p4 = pnand %p2456_p3, %p2453_p2 }
  0x2c   :  { %2461 = shalt.err (!%p2458_p4)
}
  0x2d   :  { %s2462_s0 = scalar_lea.vmem %s53_s16, 32  ;;  %p2467_p6 = scmp.lt.s32.totalorder %s53_s16, %s53_s16 }
  0x2e   :  { %p2463_p5 = scmp.ne.s32.totalorder %s53_s16, %s2462_s0  ;;  %p2468_p7 = scmp.lt.s32.totalorder %s2462_s0, %s2462_s0 }
  0x30   :  { %p2469_p8 = por %p2468_p7, %p2467_p6 }
  0x32   :  { %p2470_p9 = pnand %p2469_p8, %p2463_p5 }
  0x34   :  { %2473 = shalt.err (!%p2470_p9)
}
  0x35   :  { %55 = dma.hbm_to_vmem [thread:$0]  %s2957_s4, 32, %s53_s16, [#allocation6]  }
  0x36   :  { %s2474_s12 = scalar_lea.hbm %s2960_s7, 512 }
  0x37   :  { %p2475_p10 = scmp.ne.s32.totalorder %s2960_s7, %s2474_s12  ;;  %p2478_p11 = scmp.lt.u32.totalorder %s2474_s12, %s2960_s7 }
  0x39   :  { %p2480_p12 = pnand %p2478_p11, %p2475_p10 }
  0x3b   :  { %2483 = shalt.err (!%p2480_p12)
}
  0x3c   :  { %s2484_s21 = scalar_lea.vmem %s2620_s18, 512  ;;  %p2489_p0 = scmp.lt.s32.totalorder %s2620_s18, %s2620_s18 }
  0x3d   :  { %p2485_p13 = scmp.ne.s32.totalorder %s2620_s18, %s2484_s21  ;;  %p2490_p1 = scmp.lt.s32.totalorder %s2484_s21, %s2484_s21 }
  0x3f   :  { %p2491_p2 = por %p2490_p1, %p2489_p0 }
  0x41   :  { %p2492_p3 = pnand %p2491_p2, %p2485_p13 }
  0x43   :  { %2495 = shalt.err (!%p2492_p3)
}
  0x44   :  { %71 = dma.hbm_to_vmem [thread:$0]  %s2960_s7, 512, %s2620_s18, [#allocation9], %s2527_s19, %s2527_s19, %s2528_s20  }
  0x45   :  { %2518 = dma.done.wait [#allocation3], 128  }
  0x46   :  { %2519 = vsyncadd [#allocation3], 4294967168 }
  0x47   :  { %2520 = dma.done.wait [#allocation6], 288  }
  0x48   :  { %2521 = vsyncadd [#allocation6], 4294967008 }
  0x49   :  { %2522 = dma.done.wait [#allocation9], 512  }
  0x4a   :  { %2523 = vsyncadd [#allocation9], 4294966784  ;;  %v2534_v0 = vmov 0.0|0.0   ;;  %vm2535_vm0 = vmmov 0   ;;  %v2536_v1 = vmov 0.0   ;;  %v86_v2 = vld [vmem:[%s2954_s1] sm:$0xff] }
  0x4b   :  { %2195 = vmatprep.subr.bf16.mxu0 %v2534_v0  ;;  %1999 = vmatprep.mubr.msk.f32.mxu0 %vm2535_vm0, %v2536_v1  ;;  %v87_v3 = vld [vmem:[%s2954_s1 + $0x8] sm:$0xff]  ;;  %v88_v4 = vld [vmem:[%s2954_s1 + $0x10] sm:$0xff]  ;;  %v89_v6 = vld [vmem:[%s2954_s1 + $0x18] sm:$0xff]  ;;  %vm107_vm1 = vcmask 261120   ;;  %vm181_vm2 = vcmask 123904   ;;  %vm194_vm3 = vcmask 130048  }
  0x4c   :  { %2201 = vmatprep.subr.bf16.mxu1 %v2534_v0  ;;  %2006 = vmatprep.mubr.msk.f32.mxu1 %vm2535_vm0, %v2536_v1  ;;  %v2669_v5 = vpack.c.bf16 %v87_v3, %v86_v2  ;;  %v2675_v7 = vpack.c.bf16 %v89_v6, %v88_v4  ;;  %v106_v8 = vld [vmem:[#allocation7] sm:$0x3]  ;;  %v2686_v9 = vld [vmem:[%s2956_s3] sm:$0x3]  ;;  %v90_v19 = vld [vmem:[#allocation5] sm:$0xff]  ;;  %vm549_vm4 = vcmask 254976  }
  0x4d   :  { %v91_v20 = vld [vmem:[#allocation5 + $0x8] sm:$0xff]  ;;  %v93_v23 = vld [vmem:[%s2958_s5] sm:$0xff]  ;;  %v94_v24 = vld [vmem:[%s2958_s5 + $0x8] sm:$0xff]  ;;  %s2539_s20 = smov [#allocation10]  }
  0x4e   :  { %2197 = vmatpush3.bf16.msra.mxu0 %v2669_v5  ;;  %v2691_v21 = vpack.c.bf16 %v91_v20, %v90_v19  ;;  %v2701_v26 = vpack.c.bf16 %v94_v24, %v93_v23  ;;  %v95_v28 = vld [vmem:[%s2958_s5 + $0x10] sm:$0xff]  ;;  %v96_v29 = vld [vmem:[%s2958_s5 + $0x18] sm:$0xff]  ;;  %v193_v31 = vld [vmem:[#allocation2] sm:$0x3]  ;;  %s1858_s18 = sshll.u32 %s2539_s20, 4  ;;  %s1859_s18 = int_to_ptr.vmem [resolvable:$true] %s1858_s18 }
  0x4f   :  { %2198 = vmatprep.subr.bf16.mxu0 %v2534_v0  ;;  %v2711_v30 = vpack.c.bf16 %v96_v29, %v95_v28  ;;  %v101_v46 = vld [vmem:[#allocation8] sm:$0xff]  ;;  %v102_v47 = vld [vmem:[#allocation8 + $0x8] sm:$0xff]  ;;  %v103_v51 = vld [vmem:[#allocation8 + $0x10] sm:$0xff]  ;;  %s2496_s22 = scalar_lea.vmem %s1859_s18, 128  ;;  %p2501_p5 = scmp.lt.s32.totalorder %s1859_s18, %s1859_s18 }
  0x50   :  { %2203 = vmatpush3.bf16.msra.mxu1 %v2691_v21  ;;  %v97_v48 = vld [vmem:[%s2959_s6] sm:$0xff]  ;;  %v2730_v49 = vpack.c.bf16 %v102_v47, %v101_v46  ;;  %v98_v50 = vld [vmem:[%s2959_s6 + $0x8] sm:$0xff]  ;;  %v104_v52 = vld [vmem:[#allocation8 + $0x18] sm:$0xff]  ;;  %p2497_p4 = scmp.ne.s32.totalorder %s1859_s18, %s2496_s22  ;;  %p2502_p6 = scmp.lt.s32.totalorder %s2496_s22, %s2496_s22 }
  0x51   :  { %2204 = vmatprep.subr.bf16.mxu1 %v2534_v0  ;;  %v2735_v53 = vpack.c.bf16 %v98_v50, %v97_v48  ;;  %v99_v54 = vld [vmem:[%s2959_s6 + $0x10] sm:$0xff]  ;;  %v100_v55 = vld [vmem:[%s2959_s6 + $0x18] sm:$0xff]  ;;  %v2744_v56 = vpack.c.bf16 %v104_v52, %v103_v51  ;;  %s2537_s6 = smov 64   ;;  %v2772_v2 = vld [vmem:[%s2961_s8] ss:$0 sm:$0xff]  ;;  %s2538_s8 = smov 96  }
  0x52   :  { %2200 = vmatpush3.bf16.msra.mxu0 %v2675_v7  ;;  %v2748_v57 = vpack.c.bf16 %v100_v55, %v99_v54  ;;  %p2503_p7 = por %p2502_p6, %p2501_p5 }
  0x53   :  { %2210 = vmatprep.subr.bf16.mxu0 %v2534_v0 }
  0x54   :  { %p2504_p8 = pnand %p2503_p7, %p2497_p4 }
  0x55   :  { %2000 = vmatmul.mubr.msk.f32.vlgmr.msra.gmra.mrb[0].mxu0 %vm107_vm1, %v106_v8 }
  0x56   :  { %2028 = vmatprep.mubr.msk.f32.mxu0 %vm2535_vm0, %v2536_v1  ;;  %2212 = vmatpush3.bf16.msra.mxu0 %v2730_v49 }
  0x57   :  { %2213 = vmatprep.subr.bf16.mxu0 %v2534_v0 }
  0x5a   :  { %2215 = vmatpush3.bf16.msra.mxu0 %v2744_v56 }
  0x5b   :  { %2222 = vmatprep.subr.bf16.mxu0 %v2534_v0 }
  0x5d   :  { %2029 = vmatmul.mubr.f32.vlgmr.msra.gmra.mrb[2].mxu0 %v2536_v1 }
  0x5e   :  { %2224 = vmatpush3.bf16.msra.mxu0 %v2669_v5  ;;  %2050 = vmatprep.mubr.msk.f32.mxu0 %vm2535_vm0, %v2536_v1 }
  0x5f   :  { %2225 = vmatprep.subr.bf16.mxu0 %v2534_v0 }
  0x62   :  { %2227 = vmatpush3.bf16.msra.mxu0 %v2675_v7 }
  0x63   :  { %2237 = vmatprep.subr.bf16.mxu0 %v2534_v0 }
 0x128   :  { %v177_v10 = vpop.f32.mrb[0].mxu0 }
 0x129   :  { %v178_v11 = vadd.f32 %v177_v10, %v2686_v9  ;;  %v2001_v12 = vpop.f32.mrb[1].mxu0 }
 0x12b   :  { %v182_v13 = vsel %vm181_vm2, %v178_v11, -inf }
 0x12c   :  { %183 = vmax.xlane.f32.xlu0 %v182_v13 }
 0x130   :  { %v435_v61 = vpop.f32.mrb[2].mxu0 }
 0x131   :  { %v2030_v62 = vpop.f32.mrb[3].mxu0 }
 0x1b9   :  { %v184_v14 = vpop.xlane.xlu0 %183 }
 0x1ba   :  { %v185_v15 = vsub.f32 %v178_v11, %v184_v14 }
 0x1bc   :  { %v186_v16 = vmul.f32 1.442695, %v185_v15 }
 0x1be   :  { %2328 = vpow2.f32 %v186_v16 }
 0x1c8   :  { %v2329_v17 = vpop.eup %2328 }
 0x1c9   :  { %v188_v18 = vsel %vm181_vm2, %v2329_v17, 0.0 }
 0x1ca   :  { %189 = vadd.xlane.f32.xlu0 %v188_v18 }
 0x257   :  { %v190_v22 = vpop.xlane.xlu0 %189 }
 0x258   :  { %2330 = vrcp.f32 %v190_v22 }
 0x262   :  { %v2331_v25 = vpop.eup %2330 }
 0x263   :  { %v192_v27 = vmul.f32 %v2331_v25, %v2329_v17 }
 0x265   :  { %2007 = vmatmul.mubr.msk.f32.vlgmr.msra.gmra.mrb[0].mxu1 %vm194_vm3, %v192_v27 }
 0x266   :  { %2206 = vmatpush3.bf16.msra.mxu1 %v2701_v26  ;;  %2017 = vmatprep.mubr.msk.f32.mxu1 %vm2535_vm0, %v2536_v1 }
 0x267   :  { %2207 = vmatprep.subr.bf16.mxu1 %v2534_v0 }
 0x26a   :  { %2209 = vmatpush3.bf16.msra.mxu1 %v2711_v30 }
 0x26b   :  { %2216 = vmatprep.subr.bf16.mxu1 %v2534_v0 }
 0x26d   :  { %2018 = vmatmul.mubr.f32.vlgmr.msra.gmra.mrb[0].mxu1 %v2536_v1 }
 0x26e   :  { %2039 = vmatprep.mubr.msk.f32.mxu1 %vm2535_vm0, %v2536_v1  ;;  %2218 = vmatpush3.bf16.msra.mxu1 %v2735_v53 }
 0x26f   :  { %2219 = vmatprep.subr.bf16.mxu1 %v2534_v0 }
 0x272   :  { %2221 = vmatpush3.bf16.msra.mxu1 %v2748_v57 }
 0x273   :  { %2228 = vmatprep.subr.bf16.mxu1 %v2534_v0 }
 0x340   :  { %v337_v32 = vpop.f32.mrb[0].mxu1 }
 0x341   :  { %v2303_v33 = vadd.f32 %v337_v32, %v193_v31  ;;  %v2019_v34 = vpop.f32.mrb[1].mxu1 }
 0x343   :  { %2332 = vtanh.f32 %v2303_v33  ;;  %v1874_v36 = vmul.f32 -1.442695, %v2303_v33 }
 0x345   :  { %2334 = vpow2.f32 %v1874_v36  ;;  %v638_v36 = vld [vmem:[#allocation2 + $0x2] sm:$0x3] }
 0x34d   :  { %v2333_v35 = vpop.eup %2332 }
 0x34e   :  { %354 = vrot.lane.b32.xlu1 %v2333_v35, %s2530_s2 }
 0x34f   :  { %v2335_v37 = vpop.eup %2334 }
 0x350   :  { %v345_v38 = vadd.f32 1.0, %v2335_v37 }
 0x352   :  { %349 = vrot.lane.b32.xlu1 %v106_v8, %s2530_s2  ;;  %2336 = vrcp.f32 %v345_v38 }
 0x35c   :  { %v2337_v39 = vpop.eup %2336 }
 0x3c0   :  { %v355_v40 = vpop.permute.xlu1 %354 }
 0x3c1   :  { %v357_v41 = vmul.f32 %v2337_v39, %v355_v40 }
 0x3c3   :  { %359 = vrot.lane.b32.xlu0 %v357_v41, %s2530_s2 }
 0x3c4   :  { %v350_v42 = vpop.permute.xlu1 %349 }
 0x3c5   :  { %v352_v43 = vmul.f32 %v2337_v39, %v350_v42 }
 0x435   :  { %v360_v44 = vpop.permute.xlu0 %359 }
 0x436   :  { %v2724_v45 = vadd.f32 %v360_v44, %v352_v43 }
 0x438   :  { %2338 = vtanh.f32 %v2724_v45 }
 0x442   :  { %v2339_v58 = vpop.eup %2338 }
 0x443   :  { %365 = vrot.lane.b32.xlu1 %v2339_v58, %s2530_s2 }
 0x4b5   :  { %v366_v59 = vpop.permute.xlu1 %365 }
 0x4b6   :  { %v368_v60 = vmul.f32 %v2337_v39, %v366_v59 }
 0x4b8   :  { %440 = vrot.lane.b32.xlu1 %v368_v60, %s2537_s6 }
 0x52a   :  { %v441_v63 = vpop.permute.xlu1 %440 }
 0x52b   :  { %2040 = vmatmul.mubr.msk.f32.vlgmr.msra.gmra.mrb[2].mxu1 %vm107_vm1, %v441_v63 }
 0x52c   :  { %2230 = vmatpush3.bf16.msra.mxu1 %v2691_v21  ;;  %2057 = vmatprep.mubr.msk.f32.mxu1 %vm2535_vm0, %v2536_v1 }
 0x52d   :  { %2231 = vmatprep.subr.bf16.mxu1 %v2534_v0 }
 0x5fe   :  { %v510_v3 = vpop.f32.mrb[2].mxu1 }
 0x5ff   :  { %v511_v4 = vadd.f32 %v510_v3, %v435_v61  ;;  %v2041_v6 = vpop.f32.mrb[3].mxu1 }
 0x601   :  { %v520_v8 = vadd.f32 %v2772_v2, %v511_v4 }
 0x603   :  { %2340 = vtanh.f32 %v520_v8  ;;  %v1877_v11 = vmul.f32 -1.442695, %v520_v8 }
 0x605   :  { %2342 = vpow2.f32 %v1877_v11 }
 0x60d   :  { %v2341_v10 = vpop.eup %2340 }
 0x60e   :  { %530 = vrot.lane.b32.xlu1 %v2341_v10, %s2530_s2 }
 0x60f   :  { %v2343_v12 = vpop.eup %2342 }
 0x610   :  { %v524_v13 = vadd.f32 1.0, %v2343_v12 }
 0x612   :  { %2344 = vrcp.f32 %v524_v13 }
 0x61c   :  { %v2776_v14 = vpop.eup %2344 }
 0x61d   :  { %v528_v17 = vmul.f32 %v2776_v14, %v350_v42 }
 0x680   :  { %v531_v15 = vpop.permute.xlu1 %530 }
 0x681   :  { %v533_v16 = vmul.f32 %v2776_v14, %v531_v15 }
 0x683   :  { %535 = vrot.lane.b32.xlu1 %v533_v16, %s2530_s2 }
 0x6f5   :  { %v536_v18 = vpop.permute.xlu1 %535 }
 0x6f6   :  { %v2781_v19 = vadd.f32 %v536_v18, %v528_v17 }
 0x6f8   :  { %552 = vrot.lane.b32.xlu1 %v2781_v19, %s2538_s8 }
 0x76a   :  { %v553_v20 = vpop.permute.xlu1 %552 }
 0x76b   :  { %2051 = vmatmul.mubr.msk.f32.vlgmr.msra.gmra.mrb[4].mxu0 %vm107_vm1, %v553_v20 }
 0x76c   :  { %2239 = vmatpush3.bf16.msra.mxu0 %v2730_v49  ;;  %2079 = vmatprep.mubr.msk.f32.mxu0 %vm2535_vm0, %v2536_v1 }
 0x76d   :  { %2240 = vmatprep.subr.bf16.mxu0 %v2534_v0 }
 0x770   :  { %2242 = vmatpush3.bf16.msra.mxu0 %v2744_v56 }
 0x771   :  { %2243 = vmatprep.subr.bf16.mxu0 %v2534_v0 }
 0x83e   :  { %v622_v22 = vpop.f32.mrb[4].mxu0 }
 0x83f   :  { %v623_v23 = vadd.f32 %v622_v22, %v2686_v9  ;;  %v2052_v24 = vpop.f32.mrb[5].mxu0 }
 0x841   :  { %v626_v25 = vsel %vm181_vm2, %v623_v23, -inf }
 0x842   :  { %627 = vmax.xlane.f32.xlu1 %v626_v25 }
 0x8cf   :  { %v628_v27 = vpop.xlane.xlu1 %627 }
 0x8d0   :  { %v629_v28 = vsub.f32 %v623_v23, %v628_v27 }
 0x8d2   :  { %v630_v29 = vmul.f32 1.442695, %v629_v28 }
 0x8d4   :  { %2346 = vpow2.f32 %v630_v29 }
 0x8de   :  { %v2347_v31 = vpop.eup %2346 }
 0x8df   :  { %v632_v32 = vsel %vm181_vm2, %v2347_v31, 0.0 }
 0x8e0   :  { %633 = vadd.xlane.f32.xlu0 %v632_v32 }
 0x96d   :  { %v634_v33 = vpop.xlane.xlu0 %633 }
 0x96e   :  { %2348 = vrcp.f32 %v634_v33 }
 0x978   :  { %v2349_v34 = vpop.eup %2348 }
 0x979   :  { %v636_v35 = vmul.f32 %v2349_v34, %v2347_v31 }
 0x97b   :  { %2058 = vmatmul.mubr.msk.f32.vlgmr.msra.gmra.mrb[4].mxu1 %vm194_vm3, %v636_v35 }
 0x97c   :  { %2233 = vmatpush3.bf16.msra.mxu1 %v2701_v26  ;;  %2068 = vmatprep.mubr.msk.f32.mxu1 %vm2535_vm0, %v2536_v1 }
 0x97d   :  { %2234 = vmatprep.subr.bf16.mxu1 %v2534_v0 }
 0x980   :  { %2236 = vmatpush3.bf16.msra.mxu1 %v2711_v30 }
 0x981   :  { %2249 = vmatprep.subr.bf16.mxu1 %v2534_v0 }
 0x983   :  { %2069 = vmatmul.mubr.msk.f32.vlgmr.msra.gmra.mrb[4].mxu1 %vm107_vm1, %v441_v63 }
 0x984   :  { %2251 = vmatpush3.bf16.msra.mxu1 %v2669_v5  ;;  %2101 = vmatprep.mubr.msk.f32.mxu1 %vm2535_vm0, %v2536_v1 }
 0x985   :  { %2252 = vmatprep.subr.bf16.mxu1 %v2534_v0 }
 0x988   :  { %2254 = vmatpush3.bf16.msra.mxu1 %v2675_v7 }
 0x989   :  { %2255 = vmatprep.subr.bf16.mxu1 %v2534_v0 }
 0xa56   :  { %v778_v37 = vpop.f32.mrb[4].mxu1 }
 0xa57   :  { %v2304_v38 = vadd.f32 %v778_v37, %v638_v36  ;;  %v2070_v39 = vpop.f32.mrb[5].mxu1  ;;  %v1072_v36 = vld [vmem:[#allocation2 + $0x4] sm:$0x3] }
 0xa59   :  { %2350 = vtanh.f32 %v2304_v38  ;;  %v1881_v41 = vmul.f32 -1.442695, %v2304_v38 }
 0xa5b   :  { %2352 = vpow2.f32 %v1881_v41 }
 0xa63   :  { %v2351_v40 = vpop.eup %2350 }
 0xa64   :  { %792 = vrot.lane.b32.xlu0 %v2351_v40, %s2530_s2 }
 0xa65   :  { %v2353_v42 = vpop.eup %2352 }
 0xa66   :  { %v786_v43 = vadd.f32 1.0, %v2353_v42 }
 0xa68   :  { %2354 = vrcp.f32 %v786_v43 }
 0xa69   :  { %2356 = vtanh.f32 %v2781_v19 }
 0xa72   :  { %v2355_v44 = vpop.eup %2354 }
 0xa73   :  { %v2357_v48 = vpop.eup %2356  ;;  %v790_v50 = vmul.f32 %v2355_v44, %v2724_v45 }
 0xad6   :  { %v793_v46 = vpop.permute.xlu0 %792 }
 0xad7   :  { %v795_v47 = vmul.f32 %v2355_v44, %v793_v46 }
 0xad9   :  { %797 = vrot.lane.b32.xlu1 %v795_v47, %s2530_s2 }
 0xadd   :  { %541 = vrot.lane.b32.xlu1 %v2357_v48, %s2530_s2 }
 0xb4b   :  { %v798_v51 = vpop.permute.xlu1 %797 }
 0xb4c   :  { %v2814_v52 = vadd.f32 %v798_v51, %v790_v50 }
 0xb4e   :  { %2358 = vtanh.f32 %v2814_v52 }
 0xb4f   :  { %v542_v54 = vpop.permute.xlu1 %541 }
 0xb50   :  { %v544_v55 = vmul.f32 %v2776_v14, %v542_v54 }
 0xb52   :  { %546 = vrot.lane.b32.xlu1 %v544_v55, %s2537_s6 }
 0xb58   :  { %v2359_v58 = vpop.eup %2358 }
 0xb59   :  { %803 = vrot.lane.b32.xlu0 %v2359_v58, %s2530_s2 }
 0xbc4   :  { %v547_v59 = vpop.permute.xlu1 %546 }
 0xbc5   :  { %550 = vst.msk [vmem:[#allocation10] sm:$0x3] %vm549_vm4, %v547_v59  ;;  %2080 = vmatmul.mubr.msk.f32.vlgmr.msra.gmra.mrb[6].mxu0 %vm107_vm1, %v547_v59 }
 0xbc6   :  { %2245 = vmatpush3.bf16.msra.mxu0 %v2735_v53  ;;  %2090 = vmatprep.mubr.msk.f32.mxu0 %vm2535_vm0, %v2536_v1 }
 0xbc7   :  { %2246 = vmatprep.subr.bf16.mxu0 %v2534_v0 }
 0xbca   :  { %2248 = vmatpush3.bf16.msra.mxu0 %v2748_v57 }
 0xbcb   :  { %v804_v45 = vpop.permute.xlu0 %803  ;;  %2258 = vmatprep.subr.bf16.mxu0 %v2534_v0 }
 0xbcc   :  { %v806_v60 = vmul.f32 %v2355_v44, %v804_v45 }
 0xbce   :  { %880 = vrot.lane.b32.xlu0 %v806_v60, %s2537_s6 }
 0xc40   :  { %v881_v61 = vpop.permute.xlu0 %880 }
 0xc41   :  { %2091 = vmatmul.mubr.msk.f32.vlgmr.msra.gmra.mrb[8].mxu0 %vm107_vm1, %v881_v61 }
 0xc42   :  { %2260 = vmatpush3.bf16.msra.mxu0 %v2701_v26  ;;  %2119 = vmatprep.mubr.msk.f32.mxu0 %vm2535_vm0, %v2536_v1 }
 0xc43   :  { %2261 = vmatprep.subr.bf16.mxu0 %v2534_v0 }
 0xc46   :  { %2263 = vmatpush3.bf16.msra.mxu0 %v2711_v30 }
 0xc47   :  { %2276 = vmatprep.subr.bf16.mxu0 %v2534_v0 }
 0xc49   :  { %2120 = vmatmul.mubr.msk.f32.vlgmr.msra.gmra.mrb[10].mxu0 %vm107_vm1, %v881_v61 }
 0xc4a   :  { %2278 = vmatpush3.bf16.msra.mxu0 %v2669_v5  ;;  %2152 = vmatprep.mubr.msk.f32.mxu0 %vm2535_vm0, %v2536_v1 }
 0xc4b   :  { %2279 = vmatprep.subr.bf16.mxu0 %v2534_v0 }
 0xc4e   :  { %2281 = vmatpush3.bf16.msra.mxu0 %v2675_v7 }
 0xc4f   :  { %2291 = vmatprep.subr.bf16.mxu0 %v2534_v0 }
 0xc98   :  { %v875_v62 = vpop.f32.mrb[6].mxu0 }
 0xc99   :  { %v2081_v63 = vpop.f32.mrb[7].mxu0 }
 0xd14   :  { %v950_v3 = vpop.f32.mrb[8].mxu0 }
 0xd15   :  { %v951_v4 = vadd.f32 %v950_v3, %v875_v62  ;;  %v2092_v6 = vpop.f32.mrb[9].mxu0 }
 0xd17   :  { %v954_v8 = vadd.f32 %v2772_v2, %v951_v4 }
 0xd19   :  { %2360 = vtanh.f32 %v954_v8  ;;  %v1884_v12 = vmul.f32 -1.442695, %v954_v8 }
 0xd1b   :  { %2362 = vpow2.f32 %v1884_v12 }
 0xd1c   :  { %v1212_v10 = vpop.f32.mrb[10].mxu0 }
 0xd1d   :  { %v2121_v11 = vpop.f32.mrb[11].mxu0 }
 0xd23   :  { %v2361_v5 = vpop.eup %2360 }
 0xd24   :  { %964 = vrot.lane.b32.xlu1 %v2361_v5, %s2530_s2 }
 0xd25   :  { %v2363_v13 = vpop.eup %2362 }
 0xd26   :  { %v958_v14 = vadd.f32 1.0, %v2363_v13 }
 0xd28   :  { %2364 = vrcp.f32 %v958_v14 }
 0xd32   :  { %v2365_v7 = vpop.eup %2364 }
 0xd33   :  { %v962_v17 = vmul.f32 %v2365_v7, %v2781_v19 }
 0xd96   :  { %v965_v15 = vpop.permute.xlu1 %964 }
 0xd97   :  { %v967_v16 = vmul.f32 %v2365_v7, %v965_v15 }
 0xd99   :  { %969 = vrot.lane.b32.xlu0 %v967_v16, %s2530_s2 }
 0xe0b   :  { %v970_v18 = vpop.permute.xlu0 %969 }
 0xe0c   :  { %v2847_v20 = vadd.f32 %v970_v18, %v962_v17 }
 0xe0e   :  { %986 = vrot.lane.b32.xlu1 %v2847_v20, %s2538_s8 }
 0xe80   :  { %v987_v22 = vpop.permute.xlu1 %986 }
 0xe81   :  { %2102 = vmatmul.mubr.msk.f32.vlgmr.msra.gmra.mrb[6].mxu1 %vm107_vm1, %v987_v22 }
 0xe82   :  { %2257 = vmatpush3.bf16.msra.mxu1 %v2691_v21  ;;  %2108 = vmatprep.mubr.msk.f32.mxu1 %vm2535_vm0, %v2536_v1 }
 0xe83   :  { %2264 = vmatprep.subr.bf16.mxu1 %v2534_v0 }
 0xf54   :  { %v1056_v23 = vpop.f32.mrb[6].mxu1 }
 0xf55   :  { %v1057_v24 = vadd.f32 %v1056_v23, %v2686_v9  ;;  %v2103_v19 = vpop.f32.mrb[7].mxu1 }
 0xf57   :  { %v1060_v25 = vsel %vm181_vm2, %v1057_v24, -inf }
 0xf58   :  { %1061 = vmax.xlane.f32.xlu0 %v1060_v25 }
 0xfe5   :  { %v1062_v27 = vpop.xlane.xlu0 %1061 }
 0xfe6   :  { %v1063_v28 = vsub.f32 %v1057_v24, %v1062_v27 }
 0xfe8   :  { %v1064_v29 = vmul.f32 1.442695, %v1063_v28 }
 0xfea   :  { %2366 = vpow2.f32 %v1064_v29 }
 0xff4   :  { %v2367_v31 = vpop.eup %2366 }
 0xff5   :  { %v1066_v32 = vsel %vm181_vm2, %v2367_v31, 0.0 }
 0xff6   :  { %1067 = vadd.xlane.f32.xlu1 %v1066_v32 }
0x1083   :  { %v1068_v33 = vpop.xlane.xlu1 %1067 }
0x1084   :  { %2368 = vrcp.f32 %v1068_v33 }
0x108e   :  { %v2369_v34 = vpop.eup %2368 }
0x108f   :  { %v1070_v35 = vmul.f32 %v2369_v34, %v2367_v31 }
0x1091   :  { %2109 = vmatmul.mubr.msk.f32.vlgmr.msra.gmra.mrb[8].mxu1 %vm194_vm3, %v1070_v35 }
0x1092   :  { %2266 = vmatpush3.bf16.msra.mxu1 %v2730_v49  ;;  %2130 = vmatprep.mubr.msk.f32.mxu1 %vm2535_vm0, %v2536_v1 }
0x1093   :  { %2267 = vmatprep.subr.bf16.mxu1 %v2534_v0 }
0x1096   :  { %2269 = vmatpush3.bf16.msra.mxu1 %v2744_v56 }
0x1097   :  { %2270 = vmatprep.subr.bf16.mxu1 %v2534_v0 }
0x1164   :  { %v1142_v37 = vpop.f32.mrb[8].mxu1 }
0x1165   :  { %v1143_v38 = vadd.f32 %v1142_v37, %v1072_v36  ;;  %v2110_v39 = vpop.f32.mrb[9].mxu1 }
0x1167   :  { %v1216_v40 = vadd.f32 %v1212_v10, %v1143_v38 }
0x1169   :  { %2370 = vtanh.f32 %v1216_v40  ;;  %v1888_v43 = vmul.f32 -1.442695, %v1216_v40 }
0x116a   :  { %2372 = vtanh.f32 %v2847_v20 }
0x116b   :  { %2374 = vpow2.f32 %v1888_v43 }
0x1173   :  { %v2371_v41 = vpop.eup %2370 }
0x1174   :  { %1226 = vrot.lane.b32.xlu0 %v2371_v41, %s2530_s2  ;;  %v2373_v42 = vpop.eup %2372 }
0x1175   :  { %v2375_v44 = vpop.eup %2374 }
0x1176   :  { %v1220_v46 = vadd.f32 1.0, %v2375_v44 }
0x1178   :  { %975 = vrot.lane.b32.xlu0 %v2373_v42, %s2530_s2  ;;  %2376 = vrcp.f32 %v1220_v46 }
0x1182   :  { %v2377_v47 = vpop.eup %2376 }
0x1183   :  { %v1224_v55 = vmul.f32 %v2377_v47, %v2814_v52 }
0x11e6   :  { %v1227_v48 = vpop.permute.xlu0 %1226 }
0x11e7   :  { %v1229_v50 = vmul.f32 %v2377_v47, %v1227_v48 }
0x11e9   :  { %1231 = vrot.lane.b32.xlu1 %v1229_v50, %s2530_s2 }
0x11ea   :  { %v976_v51 = vpop.permute.xlu0 %975 }
0x11eb   :  { %v978_v54 = vmul.f32 %v2365_v7, %v976_v51 }
0x11ed   :  { %980 = vrot.lane.b32.xlu0 %v978_v54, %s2537_s6 }
0x125b   :  { %v1232_v58 = vpop.permute.xlu1 %1231 }
0x125c   :  { %v2872_v59 = vadd.f32 %v1232_v58, %v1224_v55 }
0x125e   :  { %2378 = vtanh.f32 %v2872_v59 }
0x125f   :  { %v981_v45 = vpop.permute.xlu0 %980 }
0x1260   :  { %984 = vst.msk [vmem:[#allocation10 + $0x2] sm:$0x3] %vm549_vm4, %v981_v45  ;;  %2131 = vmatmul.mubr.msk.f32.vlgmr.msra.gmra.mrb[10].mxu1 %vm107_vm1, %v981_v45 }
0x1261   :  { %2272 = vmatpush3.bf16.msra.mxu1 %v2735_v53  ;;  %2141 = vmatprep.mubr.msk.f32.mxu1 %vm2535_vm0, %v2536_v1 }
0x1262   :  { %2273 = vmatprep.subr.bf16.mxu1 %v2534_v0 }
0x1265   :  { %2275 = vmatpush3.bf16.msra.mxu1 %v2748_v57 }
0x1266   :  { %2282 = vmatprep.subr.bf16.mxu1 %v2534_v0 }
0x1268   :  { %v2379_v52 = vpop.eup %2378 }
0x1269   :  { %1237 = vrot.lane.b32.xlu1 %v2379_v52, %s2530_s2 }
0x12db   :  { %v1238_v60 = vpop.permute.xlu1 %1237 }
0x12dc   :  { %v1240_v61 = vmul.f32 %v2377_v47, %v1238_v60 }
0x12de   :  { %1314 = vrot.lane.b32.xlu1 %v1240_v61, %s2537_s6 }
0x1333   :  { %v1309_v62 = vpop.f32.mrb[10].mxu1 }
0x1334   :  { %v2132_v63 = vpop.f32.mrb[11].mxu1 }
0x1350   :  { %v1315_v3 = vpop.permute.xlu1 %1314 }
0x1351   :  { %2142 = vmatmul.mubr.msk.f32.vlgmr.msra.gmra.mrb[12].mxu1 %vm107_vm1, %v1315_v3 }
0x1352   :  { %2284 = vmatpush3.bf16.msra.mxu1 %v2691_v21  ;;  %2159 = vmatprep.mubr.msk.f32.mxu1 %vm2535_vm0, %v2536_v1 }
0x1353   :  { %2285 = vmatprep.subr.bf16.mxu1 %v2534_v0 }
0x1424   :  { %v1384_v4 = vpop.f32.mrb[12].mxu1 }
0x1425   :  { %v1385_v6 = vadd.f32 %v1384_v4, %v1309_v62  ;;  %v2143_v8 = vpop.f32.mrb[13].mxu1 }
0x1427   :  { %v1388_v10 = vadd.f32 %v2772_v2, %v1385_v6 }
0x1429   :  { %2380 = vtanh.f32 %v1388_v10  ;;  %v1891_v5 = vmul.f32 -1.442695, %v1388_v10 }
0x142b   :  { %2382 = vpow2.f32 %v1891_v5 }
0x1433   :  { %v2381_v11 = vpop.eup %2380 }
0x1434   :  { %1398 = vrot.lane.b32.xlu0 %v2381_v11, %s2530_s2 }
0x1435   :  { %v2383_v12 = vpop.eup %2382 }
0x1436   :  { %v1392_v13 = vadd.f32 1.0, %v2383_v12 }
0x1438   :  { %2384 = vrcp.f32 %v1392_v13 }
0x1442   :  { %v2385_v21 = vpop.eup %2384 }
0x1443   :  { %v1396_v15 = vmul.f32 %v2385_v21, %v2847_v20 }
0x14a6   :  { %v1399_v14 = vpop.permute.xlu0 %1398 }
0x14a7   :  { %v1401_v7 = vmul.f32 %v2385_v21, %v1399_v14 }
0x14a9   :  { %1403 = vrot.lane.b32.xlu1 %v1401_v7, %s2530_s2 }
0x151b   :  { %v1404_v16 = vpop.permute.xlu1 %1403 }
0x151c   :  { %v2894_v17 = vadd.f32 %v1404_v16, %v1396_v15 }
0x151e   :  { %1420 = vrot.lane.b32.xlu0 %v2894_v17, %s2538_s8 }
0x1590   :  { %v1421_v18 = vpop.permute.xlu0 %1420 }
0x1591   :  { %2153 = vmatmul.mubr.msk.f32.vlgmr.msra.gmra.mrb[12].mxu0 %vm107_vm1, %v1421_v18 }
0x1592   :  { %2293 = vmatpush3.bf16.msra.mxu0 %v2730_v49  ;;  %2181 = vmatprep.mubr.msk.f32.mxu0 %vm2535_vm0, %v2536_v1 }
0x1593   :  { %2294 = vmatprep.subr.bf16.mxu0 %v2534_v0 }
0x1596   :  { %2296 = vmatpush3.bf16.msra.mxu0 %v2744_v56 }
0x1597   :  { %2297 = vmatprep.subr.bf16.mxu0 %v2534_v0 }
0x1664   :  { %v1490_v20 = vpop.f32.mrb[12].mxu0 }
0x1665   :  { %v1491_v22 = vadd.f32 %v1490_v20, %v2686_v9  ;;  %v2154_v23 = vpop.f32.mrb[13].mxu0  ;;  %v1506_v9 = vld [vmem:[#allocation2 + $0x6] sm:$0x3] }
0x1667   :  { %v1494_v24 = vsel %vm181_vm2, %v1491_v22, -inf }
0x1668   :  { %1495 = vmax.xlane.f32.xlu1 %v1494_v24 }
0x16f5   :  { %v1496_v19 = vpop.xlane.xlu1 %1495 }
0x16f6   :  { %v1497_v25 = vsub.f32 %v1491_v22, %v1496_v19 }
0x16f8   :  { %v1498_v27 = vmul.f32 1.442695, %v1497_v25 }
0x16fa   :  { %2386 = vpow2.f32 %v1498_v27 }
0x1704   :  { %v2387_v49 = vpop.eup %2386 }
0x1705   :  { %v1500_v28 = vsel %vm181_vm2, %v2387_v49, 0.0 }
0x1706   :  { %1501 = vadd.xlane.f32.xlu0 %v1500_v28 }
0x1793   :  { %v1502_v29 = vpop.xlane.xlu0 %1501 }
0x1794   :  { %2388 = vrcp.f32 %v1502_v29 }
0x179e   :  { %v2389_v56 = vpop.eup %2388 }
0x179f   :  { %v1504_v31 = vmul.f32 %v2389_v56, %v2387_v49 }
0x17a1   :  { %2160 = vmatmul.mubr.msk.f32.vlgmr.msra.gmra.mrb[14].mxu1 %vm194_vm3, %v1504_v31 }
0x17a2   :  { %2287 = vmatpush3.bf16.msra.mxu1 %v2701_v26  ;;  %2170 = vmatprep.mubr.msk.f32.mxu1 %vm2535_vm0, %v2536_v1 }
0x17a3   :  { %2288 = vmatprep.subr.bf16.mxu1 %v2534_v0 }
0x17a6   :  { %2290 = vmatpush3.bf16.msra.mxu1 %v2711_v30 }
0x17a9   :  { %2171 = vmatmul.mubr.msk.f32.vlgmr.msra.gmra.mrb[14].mxu1 %vm107_vm1, %v1315_v3 }
0x187c   :  { %v1646_v32 = vpop.f32.mrb[14].mxu1 }
0x187d   :  { %v2307_v33 = vadd.f32 %v1646_v32, %v1506_v9  ;;  %v2172_v34 = vpop.f32.mrb[15].mxu1 }
0x187f   :  { %2390 = vtanh.f32 %v2307_v33  ;;  %v1895_v36 = vmul.f32 -1.442695, %v2307_v33 }
0x1881   :  { %2392 = vpow2.f32 %v1895_v36 }
0x1889   :  { %v2391_v35 = vpop.eup %2390 }
0x188a   :  { %1660 = vrot.lane.b32.xlu0 %v2391_v35, %s2530_s2 }
0x188b   :  { %v2393_v26 = vpop.eup %2392 }
0x188c   :  { %v1654_v37 = vadd.f32 1.0, %v2393_v26 }
0x188e   :  { %2394 = vrcp.f32 %v1654_v37 }
0x188f   :  { %2396 = vtanh.f32 %v2894_v17 }
0x1898   :  { %v2395_v38 = vpop.eup %2394 }
0x1899   :  { %v2397_v40 = vpop.eup %2396  ;;  %v1658_v41 = vmul.f32 %v2395_v38, %v2872_v59 }
0x18fc   :  { %v1661_v39 = vpop.permute.xlu0 %1660 }
0x18fd   :  { %v1663_v30 = vmul.f32 %v2395_v38, %v1661_v39 }
0x18ff   :  { %1665 = vrot.lane.b32.xlu1 %v1663_v30, %s2530_s2 }
0x1903   :  { %1409 = vrot.lane.b32.xlu1 %v2397_v40, %s2530_s2 }
0x1971   :  { %v1666_v42 = vpop.permute.xlu1 %1665 }
0x1972   :  { %v1668_v43 = vadd.f32 %v1666_v42, %v1658_v41 }
0x1974   :  { %2398 = vtanh.f32 %v1668_v43 }
0x1975   :  { %v1410_v44 = vpop.permute.xlu1 %1409 }
0x1976   :  { %v1412_v46 = vmul.f32 %v2385_v21, %v1410_v44 }
0x1978   :  { %1414 = vrot.lane.b32.xlu1 %v1412_v46, %s2537_s6 }
0x197e   :  { %v2399_v47 = vpop.eup %2398 }
0x197f   :  { %1671 = vrot.lane.b32.xlu0 %v2399_v47, %s2530_s2 }
0x19ea   :  { %v1415_v48 = vpop.permute.xlu1 %1414 }
0x19eb   :  { %1418 = vst.msk [vmem:[#allocation10 + $0x4] sm:$0x3] %vm549_vm4, %v1415_v48  ;;  %2182 = vmatmul.mubr.msk.f32.vlgmr.msra.gmra.mrb[14].mxu0 %vm107_vm1, %v1415_v48 }
0x19ec   :  { %2299 = vmatpush3.bf16.msra.mxu0 %v2735_v53  ;;  %2192 = vmatprep.mubr.msk.f32.mxu0 %vm2535_vm0, %v2536_v1 }
0x19ed   :  { %2300 = vmatprep.subr.bf16.mxu0 %v2534_v0 }
0x19f0   :  { %2302 = vmatpush3.bf16.msra.mxu0 %v2748_v57 }
0x19f1   :  { %v1672_v50 = vpop.permute.xlu0 %1671 }
0x19f2   :  { %v1674_v51 = vmul.f32 %v2395_v38, %v1672_v50 }
0x19f4   :  { %1748 = vrot.lane.b32.xlu0 %v1674_v51, %s2537_s6 }
0x1a66   :  { %v1749_v54 = vpop.permute.xlu0 %1748 }
0x1a67   :  { %2193 = vmatmul.mubr.msk.f32.vlgmr.msra.gmra.mrb[16].mxu0 %vm107_vm1, %v1749_v54 }
0x1abe   :  { %v1743_v55 = vpop.f32.mrb[14].mxu0 }
0x1abf   :  { %v2183_v58 = vpop.f32.mrb[15].mxu0 }
0x1b3a   :  { %v1818_v59 = vpop.f32.mrb[16].mxu0 }
0x1b3b   :  { %v1819_v45 = vadd.f32 %v1818_v59, %v1743_v55  ;;  %v2194_v52 = vpop.f32.mrb[17].mxu0 }
0x1b3d   :  { %v1822_v53 = vadd.f32 %v2772_v2, %v1819_v45 }
0x1b3f   :  { %2400 = vtanh.f32 %v1822_v53  ;;  %v1898_v0 = vmul.f32 -1.442695, %v1822_v53 }
0x1b41   :  { %2402 = vpow2.f32 %v1898_v0 }
0x1b49   :  { %v2401_v1 = vpop.eup %2400 }
0x1b4a   :  { %1832 = vrot.lane.b32.xlu1 %v2401_v1, %s2530_s2 }
0x1b4b   :  { %v2403_v57 = vpop.eup %2402 }
0x1b4c   :  { %v1826_v60 = vadd.f32 1.0, %v2403_v57 }
0x1b4e   :  { %2404 = vrcp.f32 %v1826_v60 }
0x1b58   :  { %v2405_v61 = vpop.eup %2404 }
0x1b59   :  { %v1830_v3 = vmul.f32 %v2405_v61, %v2894_v17 }
0x1bbc   :  { %v1833_v62 = vpop.permute.xlu1 %1832 }
0x1bbd   :  { %v1835_v63 = vmul.f32 %v2405_v61, %v1833_v62 }
0x1bbf   :  { %1837 = vrot.lane.b32.xlu0 %v1835_v63, %s2530_s2 }
0x1c31   :  { %v1838_v4 = vpop.permute.xlu0 %1837 }
0x1c32   :  { %v1840_v6 = vadd.f32 %v1838_v4, %v1830_v3 }
0x1c34   :  { %2406 = vtanh.f32 %v1840_v6 }
0x1c3e   :  { %v2407_v2 = vpop.eup %2406 }
0x1c3f   :  { %1843 = vrot.lane.b32.xlu1 %v2407_v2, %s2530_s2 }
0x1cb1   :  { %v1844_v8 = vpop.permute.xlu1 %1843 }
0x1cb2   :  { %v1846_v10 = vmul.f32 %v2405_v61, %v1844_v8 }
0x1cb4   :  { %1848 = vrot.lane.b32.xlu0 %v1846_v10, %s2537_s6 }
0x1d26   :  { %v1849_v11 = vpop.permute.xlu0 %1848 }
0x1d27   :  { %1852 = vst.msk [vmem:[#allocation10 + $0x6] sm:$0x3] %vm549_vm4, %v1849_v11 }
0x1d28   :  { %2507 = shalt.err (!%p2504_p8)
}
0x1d29   :  { %s2508_s26 = scalar_lea.hbm %s2962_s9, 128 }
0x1d2a   :  { %p2509_p9 = scmp.ne.s32.totalorder %s2962_s9, %s2508_s26  ;;  %p2512_p10 = scmp.lt.u32.totalorder %s2508_s26, %s2962_s9 }
0x1d2c   :  { %p2514_p11 = pnand %p2512_p10, %p2509_p9 }
0x1d2e   :  { %2517 = shalt.err (!%p2514_p11)
}
0x1d2f   :  { %1864 = dma.vmem_to_hbm [thread:$0]  %s1859_s18, 128, %s2962_s9, [#allocation4], %s2530_s2, %s2530_s2, %s2531_s10  }
0x1d30   :  { %2524 = dma.done.wait [#allocation4], 128  }
0x1d31   :  { %2525 = vsyncadd [#allocation4], 4294967168 }
0x1d32   :  { %1868 = vsyncpa [#allocation3], 1 }
0x1d33   :  { %1869 = vsyncpa [#allocation6], 1 }
0x1d34   :  { %1870 = vsyncpa [#allocation9], 1 }
0x1d35   :  { %1871 = vsyncpa [#allocation4], 1 }

</bundles_post_ra>
